<compile_context>
chip_gen: v6e
topology: v6e:2x2x1
jax: 0.10.0
libtpu: 0.0.40
codegen_flags: <defaults>
</compile_context>

<pallas_src>
import jax
import jax.numpy as jnp
import numpy as np
from jax.experimental import pallas as pl
from jax.experimental.pallas import tpu as pltpu


# ----------------------------- Pallas kernel --------------------------------

def _layernorm(x, gamma, beta, eps=1e-5):
    mu = jnp.mean(x, axis=-1, keepdims=True)
    var = jnp.mean((x - mu) ** 2, axis=-1, keepdims=True)
    return (x - mu) * jax.lax.rsqrt(var + eps) * gamma + beta


def reward_kernel(ids_ref, mq_ref, ms_ref,
                  tok_ref, pos_ref, wqkv_ref, wo_ref, w1_ref, w2_ref, wr1_ref,
                  ph_ref, p2_ref,
                  out_ref):
    TB, S, _ = ids_ref.shape
    VOCAB, H = tok_ref.shape
    FFN = w1_ref.shape[1]
    RH = wr1_ref.shape[1]
    f32 = jnp.float32
    bf16 = jnp.bfloat16

    ph = ph_ref[...]          # (9, H) f32 packed: bq,bk,bv,bo,g1,be1,b2,g2,be2
    p2 = p2_ref[...]          # (4, P) f32 packed: b1, br1, wr2^T, br2

    # ---- in-kernel token embedding: one-hot matmul on the MXU + pos-emb add ----
    # (removes the HBM write+read of a B*S*H fp32 activation tensor)
    ids = ids_ref[...]                                                    # (TB,S,1) int32
    vocab_iota = jax.lax.broadcasted_iota(jnp.int32, (TB, S, VOCAB), 2)
    onehot = (vocab_iota == ids).astype(bf16).reshape(TB * S, VOCAB)
    x2 = jnp.dot(onehot, tok_ref[...], preferred_element_type=f32)        # (TB*S, H)
    x3 = x2.reshape(TB, S, H) + pos_ref[...].astype(f32)[None]            # (TB, S, H)
    x2 = x3.reshape(TB * S, H)                                            # f32 residual base

    # ---- fused QKV projection: bf16 MXU operands, f32 accumulation ----
    qkv = jnp.dot(x2.astype(bf16), wqkv_ref[...], preferred_element_type=f32)
    q = (qkv[:, 0 * H:1 * H] + ph[0:1]).reshape(TB, S, H)
    k = (qkv[:, 1 * H:2 * H] + ph[1:2]).reshape(TB, S, H)
    v = (qkv[:, 2 * H:3 * H] + ph[2:3]).reshape(TB, S, H)

    # ---- single-head self-attention, batched over the TB rows ----
    mask_k = mq_ref[...]                                                  # (TB,1,S)
    scale = 1.0 / jnp.sqrt(f32(H))
    scores = jnp.einsum('bqd,bkd->bqk', q.astype(bf16), k.astype(bf16),
                        preferred_element_type=f32) * scale               # (TB,S,S) f32
    scores = scores + (mask_k - 1.0) * 1e9                                # mask keys
    scores = scores - jnp.max(scores, axis=-1, keepdims=True)
    probs = jnp.exp(scores)
    attn = probs * pl.reciprocal(jnp.sum(probs, axis=-1, keepdims=True), approx=True)
    ctx = jnp.einsum('bqk,bkd->bqd', attn.astype(bf16), v.astype(bf16),
                     preferred_element_type=f32)                          # (TB,S,H)

    attn_out = jnp.dot(ctx.reshape(TB * S, H).astype(bf16), wo_ref[...],
                       preferred_element_type=f32) + ph[3:4]
    h1 = _layernorm(x2 + attn_out, ph[4:5], ph[5:6])                      # (TB*S, H) f32

    # ---- feed-forward ----
    ffn = jnp.maximum(
        jnp.dot(h1.astype(bf16), w1_ref[...], preferred_element_type=f32)
        + p2[0:1, :FFN], 0.0)
    ffn = jnp.dot(ffn.astype(bf16), w2_ref[...], preferred_element_type=f32) + ph[6:7]
    h2 = _layernorm(h1 + ffn, ph[7:8], ph[8:9])                           # (TB*S, H) f32

    # ---- masked mean pooling (VPU multiply + sublane reduce, exact divide) ----
    mask_s = ms_ref[...]                                                  # (TB,S,1)
    denom = jnp.maximum(jnp.sum(mask_k, axis=-1), 1.0)                    # (TB,1) exact count
    pooled = jnp.sum(h2.reshape(TB, S, H) * mask_s, axis=1) / denom       # (TB,H)

    # ---- reward head: Linear(H, 64) -> ReLU -> Linear(64, 1) ----
    r1 = jnp.maximum(
        jnp.dot(pooled.astype(bf16), wr1_ref[...], preferred_element_type=f32)
        + p2[1:2, :RH], 0.0)
    # final RH->1 projection on the VPU + lane reduce (avoids an N=1 MXU matmul)
    r = jnp.sum(r1 * p2[2:3, :RH], axis=-1, keepdims=True) + p2[3:4, 0:1]  # (TB,1)
    out_ref[...] = r


# ------------------------------ Wrapper --------------------------------------

def _pack_params(p, seq_len):
    """bf16 MXU weights (fused QKV) + two small f32 bias/LN/head-param packs."""
    FFN = p["w1"].shape[1]
    RH = p["wr1"].shape[1]
    P = max(FFN, RH)
    bf = jnp.bfloat16

    tok = p["tok_emb"].astype(bf)                                          # (V, H)
    pos = p["pos_emb"][:seq_len].astype(bf)                                # (S, H)
    wqkv = jnp.concatenate([p["wq"], p["wk"], p["wv"]], axis=1).astype(bf)  # (H, 3H)
    wo = p["wo"].astype(bf)
    w1 = p["w1"].astype(bf)
    w2 = p["w2"].astype(bf)
    wr1 = p["wr1"].astype(bf)

    ph = jnp.concatenate([p["bq"], p["bk"], p["bv"], p["bo"],
                          p["g1"], p["be1"], p["b2"], p["g2"], p["be2"]],
                         axis=0).astype(jnp.float32)                        # (9, H)

    def pad(v):
        return jnp.pad(v, ((0, 0), (0, P - v.shape[1])))

    p2 = jnp.concatenate([pad(p["b1"]), pad(p["br1"]),
                          pad(p["wr2"].T), pad(p["br2"])],
                         axis=0).astype(jnp.float32)                        # (4, P)
    return (tok, pos, wqkv, wo, w1, w2, wr1, ph, p2)


def _choose_tb(B, S, H, vmem_bytes, num_cores):
    """VMEM-aware and core-aware batch-tile size (review items 4 & 5)."""
    per_row = 4 * (12 * S * H + 4 * S * S)          # rough f32 intermediates / row
    budget = max(vmem_bytes // 4, 1 << 20)          # keep tiles <= ~1/4 of VMEM
    tb = max(1, min(B, budget // max(per_row, 1), 256))
    if num_cores > 1 and B >= 16:
        tb = min(tb, -(-B // num_cores))            # >=1 grid step per TensorCore
    if tb < B:
        tb = max(8, (tb // 8) * 8)                  # sublane-aligned tiles when tiling
    return int(tb)


def _vmem_limit_bytes(TB, S, H, ffn, rh, vocab, P):
    w = 2 * (vocab * H + S * H + 4 * H * H + 2 * H * ffn + H * rh) + 4 * (9 * H + 4 * P)
    tiles = 4 * TB * 3 * S                           # ids + two masks (per buffer)
    inter = 4 * TB * (S * vocab // 2 + 12 * S * H + 4 * S * S + 2 * H)
    est = 2 * w + 4 * tiles + inter
    return int(min(48 << 20, max(16 << 20, 2 * est)))   # <=48 MiB for v7x headroom


def _build_call(nb, TB, S, weight_shapes, vmem_limit, single_buffer_weights):
    def wspec(shape):
        if single_buffer_weights:
            # constant-index resident weights: one buffer is enough (VMEM headroom)
            return pl.BlockSpec(shape, lambda b: (0, 0), pipeline_mode=pl.Buffered(1))
        return pl.BlockSpec(shape, lambda b: (0, 0))

    in_specs = [
        pl.BlockSpec((TB, S, 1), lambda b: (b, 0, 0)),   # input_ids tile
        pl.BlockSpec((TB, 1, S), lambda b: (b, 0, 0)),   # mask, key orientation
        pl.BlockSpec((TB, S, 1), lambda b: (b, 0, 0)),   # mask, pooling orientation
    ] + [wspec(s) for s in weight_shapes]

    return pl.pallas_call(
        reward_kernel,
        out_shape=jax.ShapeDtypeStruct((nb * TB, 1), jnp.float32),
        grid=(nb,),
        in_specs=in_specs,
        out_specs=pl.BlockSpec((TB, 1), lambda b: (b, 0)),
        compiler_params=pltpu.CompilerParams(
            dimension_semantics=("parallel",),
            vmem_limit_bytes=vmem_limit),
    )


def reward_model_forward(input_ids, attention_mask, params):
    B, S = input_ids.shape
    H = params["tok_emb"].shape[-1]
    VOCAB = params["tok_emb"].shape[0]
    FFN = params["w1"].shape[1]
    RH = params["wr1"].shape[1]
    P = max(FFN, RH)

    # hardware-aware tile sizing (falls back to safe defaults off-TPU)
    try:
        vmem_bytes = int(pltpu.get_tpu_info().vmem_capacity_bytes)
    except Exception:
        vmem_bytes = 64 << 20
    num_cores = max(1, int(getattr(jax.devices()[0], "num_cores", 1) or 1))

    TB = _choose_tb(B, S, H, vmem_bytes, num_cores)
    nb = -(-B // TB)
    B_pad = nb * TB

    ids3 = input_ids.astype(jnp.int32)[:, :, None]                   # (B, S, 1)
    mask_q = attention_mask.astype(jnp.float32)[:, None, :]          # (B, 1, S)
    mask_s = attention_mask.astype(jnp.float32)[:, :, None]          # (B, S, 1)
    if B_pad != B:   # padded rows have mask=0; results sliced off below
        ids3 = jnp.pad(ids3, ((0, B_pad - B), (0, 0), (0, 0)))
        mask_q = jnp.pad(mask_q, ((0, B_pad - B), (0, 0), (0, 0)))
        mask_s = jnp.pad(mask_s, ((0, B_pad - B), (0, 0), (0, 0)))

    weights = _pack_params(params, S)
    weight_shapes = [w.shape for w in weights]
    vmem_limit = _vmem_limit_bytes(TB, S, H, FFN, RH, VOCAB, P)

    try:
        out = _build_call(nb, TB, S, weight_shapes, vmem_limit,
                          single_buffer_weights=True)(ids3, mask_q, mask_s, *weights)
    except Exception:
        # fallback if this JAX build rejects pipeline_mode=pl.Buffered(1)
        out = _build_call(nb, TB, S, weight_shapes, vmem_limit,
                          single_buffer_weights=False)(ids3, mask_q, mask_s, *weights)

    return out[:B]


# --------------------------- Parameter init -----------------------------------

def init_params(key, vocab=100, max_len=16, hidden=32, ffn=64, reward_hidden=64):
    ks = jax.random.split(key, 16)
    s = 0.02
    p = {
        "tok_emb": s * jax.random.normal(ks[0], (vocab, hidden), jnp.float32),
        "pos_emb": s * jax.random.normal(ks[1], (max_len, hidden), jnp.float32),
        "wq": s * jax.random.normal(ks[2], (hidden, hidden), jnp.float32),
        "bq": jnp.zeros((1, hidden), jnp.float32),
        "wk": s * jax.random.normal(ks[3], (hidden, hidden), jnp.float32),
        "bk": jnp.zeros((1, hidden), jnp.float32),
        "wv": s * jax.random.normal(ks[4], (hidden, hidden), jnp.float32),
        "bv": jnp.zeros((1, hidden), jnp.float32),
        "wo": s * jax.random.normal(ks[5], (hidden, hidden), jnp.float32),
        "bo": jnp.zeros((1, hidden), jnp.float32),
        "g1": jnp.ones((1, hidden), jnp.float32),
        "be1": jnp.zeros((1, hidden), jnp.float32),
        "w1": s * jax.random.normal(ks[6], (hidden, ffn), jnp.float32),
        "b1": jnp.zeros((1, ffn), jnp.float32),
        "w2": s * jax.random.normal(ks[7], (ffn, hidden), jnp.float32),
        "b2": jnp.zeros((1, hidden), jnp.float32),
        "g2": jnp.ones((1, hidden), jnp.float32),
        "be2": jnp.zeros((1, hidden), jnp.float32),
        "wr1": s * jax.random.normal(ks[8], (hidden, reward_hidden), jnp.float32),
        "br1": 0.01 * jnp.ones((1, reward_hidden), jnp.float32),
        "wr2": s * jax.random.normal(ks[9], (reward_hidden, 1), jnp.float32),
        "br2": jnp.zeros((1, 1), jnp.float32),
    }
    return p


# --------------------------- Pure-JAX reference --------------------------------

def reward_model_ref(input_ids, attention_mask, p):
    """Pure-JAX reference mirroring the kernel's mixed-precision policy
    (bf16 MXU operands, f32 accumulation, f32 element-wise math)."""
    bf16, f32 = jnp.bfloat16, jnp.float32
    B, S = input_ids.shape
    H = p["tok_emb"].shape[-1]

    def dot(a, w):
        return jnp.dot(a.astype(bf16), w.astype(bf16), preferred_element_type=f32)

    def ln(x, g, b, eps=1e-5):
        mu = x.mean(-1, keepdims=True)
        var = ((x - mu) ** 2).mean(-1, keepdims=True)
        return (x - mu) * jax.lax.rsqrt(var + eps) * g + b

    tok = p["tok_emb"].astype(bf16).astype(f32)
    pos = p["pos_emb"][:S].astype(bf16).astype(f32)
    x = tok[input_ids] + pos[None]                                   # (B,S,H) f32
    mask = attention_mask.astype(f32)[:, None, :]                    # (B,1,S)

    xf = x.reshape(B * S, H)
    q = (dot(xf, p["wq"]) + p["bq"]).reshape(B, S, H)
    k = (dot(xf, p["wk"]) + p["bk"]).reshape(B, S, H)
    v = (dot(xf, p["wv"]) + p["bv"]).reshape(B, S, H)
    sc = jnp.einsum("bsh,bth->bst", q.astype(bf16), k.astype(bf16),
                    preferred_element_type=f32) / jnp.sqrt(f32(H))
    sc = sc + (mask - 1.0) * 1e9
    a = jax.nn.softmax(sc, axis=-1)
    ctx = jnp.einsum("bst,bth->bsh", a.astype(bf16), v.astype(bf16),
                     preferred_element_type=f32)
    h1 = ln(xf + dot(ctx.reshape(B * S, H), p["wo"]) + p["bo"], p["g1"], p["be1"])
    f = jnp.maximum(dot(h1, p["w1"]) + p["b1"], 0.0)
    f = dot(f, p["w2"]) + p["b2"]
    h2 = ln(h1 + f, p["g2"], p["be2"]).reshape(B, S, H)

    m = attention_mask.astype(f32)
    denom = jnp.maximum(m.sum(-1, keepdims=True), 1.0)               # (B,1)
    pooled = (h2 * m[:, :, None]).sum(1) / denom                     # (B,H)

    r1 = jnp.maximum(dot(pooled, p["wr1"]) + p["br1"], 0.0)
    r = (r1 * p["wr2"][:, 0][None, :]).sum(-1, keepdims=True) + p["br2"]
    return r                                                         # (B,1)


# --------------------------------- Main ----------------------------------------

if __name__ == "__main__":
    B, S = 2, 8
    VOCAB, MAX_LEN, H = 100, 16, 32

    key = jax.random.PRNGKey(0)
    k_ids, k_params = jax.random.split(key)

    params = init_params(k_params, vocab=VOCAB, max_len=MAX_LEN, hidden=H)

    input_ids = jax.random.randint(k_ids, (B, S), 0, VOCAB, dtype=jnp.int32)
    attention_mask = jnp.array([[1, 1, 1, 1, 1, 1, 0, 0],
                                [1, 1, 1, 1, 1, 1, 1, 1]], dtype=jnp.int32)

    reward = jax.block_until_ready(reward_model_forward(input_ids, attention_mask, params))
    reward_ref = jax.block_until_ready(reward_model_ref(input_ids, attention_mask, params))

    # Tolerance covers the approximate EUP reciprocal on the softmax denominator
    # and bf16/f32 accumulation-order differences vs. the XLA reference.
    np.testing.assert_allclose(np.asarray(reward), np.asarray(reward_ref),
                               rtol=2e-2, atol=2e-3)

    assert reward.shape == (B, 1)
    print("KERNEL_OK")
</pallas_src>

<mosaic_0001>
module attributes {stable_mosaic.version = 11 : i64} {
  func.func @reward_kernel(%arg0: i32, %arg1: memref<2x8x1xi32, #tpu.memory_space<vmem>>, %arg2: memref<2x1x8xf32, #tpu.memory_space<vmem>>, %arg3: memref<2x8x1xf32, #tpu.memory_space<vmem>>, %arg4: memref<100x32xbf16, #tpu.memory_space<vmem>>, %arg5: memref<8x32xbf16, #tpu.memory_space<vmem>>, %arg6: memref<32x96xbf16, #tpu.memory_space<vmem>>, %arg7: memref<32x32xbf16, #tpu.memory_space<vmem>>, %arg8: memref<32x64xbf16, #tpu.memory_space<vmem>>, %arg9: memref<64x32xbf16, #tpu.memory_space<vmem>>, %arg10: memref<32x64xbf16, #tpu.memory_space<vmem>>, %arg11: memref<9x32xf32, #tpu.memory_space<vmem>>, %arg12: memref<4x64xf32, #tpu.memory_space<vmem>>, %arg13: memref<2x1xf32, #tpu.memory_space<vmem>>) attributes {dimension_semantics = [#tpu.dimension_semantics<parallel>], iteration_bounds = array<i64: 1>, scalar_prefetch = 0 : i64, scratch_operands = 0 : i64, tpu.core_type = #tpu.core_type<tc>, window_params = [{transform_indices = @transform_0, window_bounds = array<i64: 2, 8, 1>}, {transform_indices = @transform_1, window_bounds = array<i64: 2, 1, 8>}, {transform_indices = @transform_2, window_bounds = array<i64: 2, 8, 1>}, {pipeline_mode = #tpu.pipeline_mode<synchronous>, transform_indices = @transform_3, window_bounds = array<i64: 100, 32>}, {pipeline_mode = #tpu.pipeline_mode<synchronous>, transform_indices = @transform_4, window_bounds = array<i64: 8, 32>}, {pipeline_mode = #tpu.pipeline_mode<synchronous>, transform_indices = @transform_5, window_bounds = array<i64: 32, 96>}, {pipeline_mode = #tpu.pipeline_mode<synchronous>, transform_indices = @transform_6, window_bounds = array<i64: 32, 32>}, {pipeline_mode = #tpu.pipeline_mode<synchronous>, transform_indices = @transform_7, window_bounds = array<i64: 32, 64>}, {pipeline_mode = #tpu.pipeline_mode<synchronous>, transform_indices = @transform_8, window_bounds = array<i64: 64, 32>}, {pipeline_mode = #tpu.pipeline_mode<synchronous>, transform_indices = @transform_9, window_bounds = array<i64: 32, 64>}, {pipeline_mode = #tpu.pipeline_mode<synchronous>, transform_indices = @transform_10, window_bounds = array<i64: 9, 32>}, {pipeline_mode = #tpu.pipeline_mode<synchronous>, transform_indices = @transform_11, window_bounds = array<i64: 4, 64>}, {transform_indices = @transform_12, window_bounds = array<i64: 2, 1>}]} {
    %c0 = arith.constant 0 : index
    %c0_0 = arith.constant 0 : index
    %0 = vector.load %arg11[%c0, %c0_0] : memref<9x32xf32, #tpu.memory_space<vmem>>, vector<9x32xf32>
    %c0_1 = arith.constant 0 : index
    %c0_2 = arith.constant 0 : index
    %1 = vector.load %arg12[%c0_1, %c0_2] : memref<4x64xf32, #tpu.memory_space<vmem>>, vector<4x64xf32>
    %c0_3 = arith.constant 0 : index
    %c0_4 = arith.constant 0 : index
    %c0_5 = arith.constant 0 : index
    %2 = vector.load %arg1[%c0_3, %c0_4, %c0_5] : memref<2x8x1xi32, #tpu.memory_space<vmem>>, vector<2x8x1xi32>
    %3 = tpu.iota {dimensions = array<i32: 2>} : vector<2x8x100xi32>
    %4 = vector.broadcast %2 : vector<2x8x1xi32> to vector<2x8x100xi32>
    %5 = arith.cmpi eq, %3, %4 : vector<2x8x100xi32>
    %6 = arith.extui %5 : vector<2x8x100xi1> to vector<2x8x100xi32>
    %7 = arith.sitofp %6 : vector<2x8x100xi32> to vector<2x8x100xf32>
    %8 = arith.truncf %7 : vector<2x8x100xf32> to vector<2x8x100xbf16>
    %9 = vector.shape_cast %8 : vector<2x8x100xbf16> to vector<16x100xbf16>
    %c0_6 = arith.constant 0 : index
    %c0_7 = arith.constant 0 : index
    %10 = vector.load %arg4[%c0_6, %c0_7] : memref<100x32xbf16, #tpu.memory_space<vmem>>, vector<100x32xbf16>
    %cst = arith.constant dense<0.000000e+00> : vector<16x32xf32>
    %11 = tpu.matmul %9, %10, %cst {dimension_numbers = #tpu.dot_dimension_numbers<[1], [0], [0], [1], [0, 0, 1, 1], [], []>} : vector<16x100xbf16>, vector<100x32xbf16>, vector<16x32xf32> -> vector<16x32xf32>
    %12 = vector.shape_cast %11 : vector<16x32xf32> to vector<2x8x32xf32>
    %c0_8 = arith.constant 0 : index
    %c0_9 = arith.constant 0 : index
    %13 = vector.load %arg5[%c0_8, %c0_9] : memref<8x32xbf16, #tpu.memory_space<vmem>>, vector<8x32xbf16>
    %14 = arith.extf %13 : vector<8x32xbf16> to vector<8x32xf32>
    %15 = vector.shape_cast %14 : vector<8x32xf32> to vector<1x8x32xf32>
    %16 = vector.broadcast %15 : vector<1x8x32xf32> to vector<2x8x32xf32>
    %17 = arith.addf %12, %16 : vector<2x8x32xf32>
    %18 = vector.shape_cast %17 : vector<2x8x32xf32> to vector<16x32xf32>
    %19 = arith.truncf %18 : vector<16x32xf32> to vector<16x32xbf16>
    %c0_10 = arith.constant 0 : index
    %c0_11 = arith.constant 0 : index
    %20 = vector.load %arg6[%c0_10, %c0_11] : memref<32x96xbf16, #tpu.memory_space<vmem>>, vector<32x96xbf16>
    %cst_12 = arith.constant dense<0.000000e+00> : vector<16x96xf32>
    %21 = tpu.matmul %19, %20, %cst_12 {dimension_numbers = #tpu.dot_dimension_numbers<[1], [0], [0], [1], [0, 0, 1, 1], [], []>} : vector<16x32xbf16>, vector<32x96xbf16>, vector<16x96xf32> -> vector<16x96xf32>
    %22 = vector.extract_strided_slice %21 {offsets = [0, 0], sizes = [16, 32], strides = [1, 1]} : vector<16x96xf32> to vector<16x32xf32>
    %23 = vector.extract_strided_slice %0 {offsets = [0, 0], sizes = [1, 32], strides = [1, 1]} : vector<9x32xf32> to vector<1x32xf32>
    %24 = vector.broadcast %23 : vector<1x32xf32> to vector<16x32xf32>
    %25 = arith.addf %22, %24 : vector<16x32xf32>
    %26 = vector.shape_cast %25 : vector<16x32xf32> to vector<2x8x32xf32>
    %27 = vector.extract_strided_slice %21 {offsets = [0, 32], sizes = [16, 32], strides = [1, 1]} : vector<16x96xf32> to vector<16x32xf32>
    %28 = vector.extract_strided_slice %0 {offsets = [1, 0], sizes = [1, 32], strides = [1, 1]} : vector<9x32xf32> to vector<1x32xf32>
    %29 = vector.broadcast %28 : vector<1x32xf32> to vector<16x32xf32>
    %30 = arith.addf %27, %29 : vector<16x32xf32>
    %31 = vector.shape_cast %30 : vector<16x32xf32> to vector<2x8x32xf32>
    %32 = vector.extract_strided_slice %21 {offsets = [0, 64], sizes = [16, 32], strides = [1, 1]} : vector<16x96xf32> to vector<16x32xf32>
    %33 = vector.extract_strided_slice %0 {offsets = [2, 0], sizes = [1, 32], strides = [1, 1]} : vector<9x32xf32> to vector<1x32xf32>
    %34 = vector.broadcast %33 : vector<1x32xf32> to vector<16x32xf32>
    %35 = arith.addf %32, %34 : vector<16x32xf32>
    %36 = vector.shape_cast %35 : vector<16x32xf32> to vector<2x8x32xf32>
    %c0_13 = arith.constant 0 : index
    %c0_14 = arith.constant 0 : index
    %c0_15 = arith.constant 0 : index
    %37 = vector.load %arg2[%c0_13, %c0_14, %c0_15] : memref<2x1x8xf32, #tpu.memory_space<vmem>>, vector<2x1x8xf32>
    %cst_16 = arith.constant 3.200000e+01 : f32
    %38 = math.sqrt %cst_16 : f32
    %cst_17 = arith.constant 1.000000e+00 : f32
    %39 = arith.divf %cst_17, %38 : f32
    %40 = arith.truncf %26 : vector<2x8x32xf32> to vector<2x8x32xbf16>
    %41 = arith.truncf %31 : vector<2x8x32xf32> to vector<2x8x32xbf16>
    "tpu.trace_start"() <{level = 10 : i32, message = "bqd,bkd->bqk"}> : () -> ()
    %cst_18 = arith.constant dense<0.000000e+00> : vector<2x8x8xf32>
    %42 = tpu.matmul %40, %41, %cst_18 {dimension_numbers = #tpu.dot_dimension_numbers<[2], [2], [1], [1], [0, 0, 0, 1, 1, 1], [0], [0]>} : vector<2x8x32xbf16>, vector<2x8x32xbf16>, vector<2x8x8xf32> -> vector<2x8x8xf32>
    "tpu.trace_stop"() : () -> ()
    %43 = vector.broadcast %39 : f32 to vector<2x8x8xf32>
    %44 = arith.mulf %42, %43 : vector<2x8x8xf32>
    %cst_19 = arith.constant 1.000000e+00 : f32
    %45 = vector.broadcast %cst_19 : f32 to vector<2x1x8xf32>
    %46 = arith.subf %37, %45 : vector<2x1x8xf32>
    %cst_20 = arith.constant 1.000000e+09 : f32
    %47 = vector.broadcast %cst_20 : f32 to vector<2x1x8xf32>
    %48 = arith.mulf %46, %47 : vector<2x1x8xf32>
    %49 = vector.broadcast %48 : vector<2x1x8xf32> to vector<2x8x8xf32>
    %50 = arith.addf %44, %49 : vector<2x8x8xf32>
    %cst_21 = arith.constant dense<0xFF800000> : vector<2x8xf32>
    %51 = vector.multi_reduction <maximumf>, %50, %cst_21 [2] : vector<2x8x8xf32> to vector<2x8xf32>
    %52 = vector.shape_cast %51 : vector<2x8xf32> to vector<2x8x1xf32>
    %53 = vector.broadcast %52 : vector<2x8x1xf32> to vector<2x8x8xf32>
    %54 = arith.subf %50, %53 : vector<2x8x8xf32>
    %55 = math.exp %54 : vector<2x8x8xf32>
    %cst_22 = arith.constant dense<0.000000e+00> : vector<2x8xf32>
    %56 = vector.multi_reduction <add>, %55, %cst_22 [2] : vector<2x8x8xf32> to vector<2x8xf32>
    %57 = vector.shape_cast %56 : vector<2x8xf32> to vector<2x8x1xf32>
    %58 = tpu.reciprocal %57 {approx = true} : vector<2x8x1xf32> -> vector<2x8x1xf32>
    %59 = vector.broadcast %58 : vector<2x8x1xf32> to vector<2x8x8xf32>
    %60 = arith.mulf %55, %59 : vector<2x8x8xf32>
    %61 = arith.truncf %60 : vector<2x8x8xf32> to vector<2x8x8xbf16>
    %62 = arith.truncf %36 : vector<2x8x32xf32> to vector<2x8x32xbf16>
    "tpu.trace_start"() <{level = 10 : i32, message = "bqk,bkd->bqd"}> : () -> ()
    %cst_23 = arith.constant dense<0.000000e+00> : vector<2x8x32xf32>
    %63 = tpu.matmul %61, %62, %cst_23 {dimension_numbers = #tpu.dot_dimension_numbers<[2], [1], [1], [2], [0, 0, 0, 1, 1, 2], [0], [0]>} : vector<2x8x8xbf16>, vector<2x8x32xbf16>, vector<2x8x32xf32> -> vector<2x8x32xf32>
    "tpu.trace_stop"() : () -> ()
    %64 = vector.shape_cast %63 : vector<2x8x32xf32> to vector<16x32xf32>
    %65 = arith.truncf %64 : vector<16x32xf32> to vector<16x32xbf16>
    %c0_24 = arith.constant 0 : index
    %c0_25 = arith.constant 0 : index
    %66 = vector.load %arg7[%c0_24, %c0_25] : memref<32x32xbf16, #tpu.memory_space<vmem>>, vector<32x32xbf16>
    %cst_26 = arith.constant dense<0.000000e+00> : vector<16x32xf32>
    %67 = tpu.matmul %65, %66, %cst_26 {dimension_numbers = #tpu.dot_dimension_numbers<[1], [0], [0], [1], [0, 0, 1, 1], [], []>} : vector<16x32xbf16>, vector<32x32xbf16>, vector<16x32xf32> -> vector<16x32xf32>
    %68 = vector.extract_strided_slice %0 {offsets = [3, 0], sizes = [1, 32], strides = [1, 1]} : vector<9x32xf32> to vector<1x32xf32>
    %69 = vector.broadcast %68 : vector<1x32xf32> to vector<16x32xf32>
    %70 = arith.addf %67, %69 : vector<16x32xf32>
    %71 = arith.addf %18, %70 : vector<16x32xf32>
    %72 = vector.extract_strided_slice %0 {offsets = [4, 0], sizes = [1, 32], strides = [1, 1]} : vector<9x32xf32> to vector<1x32xf32>
    %73 = vector.extract_strided_slice %0 {offsets = [5, 0], sizes = [1, 32], strides = [1, 1]} : vector<9x32xf32> to vector<1x32xf32>
    %cst_27 = arith.constant dense<0.000000e+00> : vector<16xf32>
    %74 = vector.multi_reduction <add>, %71, %cst_27 [1] : vector<16x32xf32> to vector<16xf32>
    %75 = vector.shape_cast %74 : vector<16xf32> to vector<16x1xf32>
    %cst_28 = arith.constant 3.200000e+01 : f32
    %76 = vector.broadcast %cst_28 : f32 to vector<16x1xf32>
    %77 = arith.divf %75, %76 : vector<16x1xf32>
    %78 = vector.broadcast %77 : vector<16x1xf32> to vector<16x32xf32>
    %79 = arith.subf %71, %78 : vector<16x32xf32>
    %80 = arith.mulf %79, %79 : vector<16x32xf32>
    %cst_29 = arith.constant dense<0.000000e+00> : vector<16xf32>
    %81 = vector.multi_reduction <add>, %80, %cst_29 [1] : vector<16x32xf32> to vector<16xf32>
    %82 = vector.shape_cast %81 : vector<16xf32> to vector<16x1xf32>
    %cst_30 = arith.constant 3.200000e+01 : f32
    %83 = vector.broadcast %cst_30 : f32 to vector<16x1xf32>
    %84 = arith.divf %82, %83 : vector<16x1xf32>
    %85 = vector.broadcast %77 : vector<16x1xf32> to vector<16x32xf32>
    %86 = arith.subf %71, %85 : vector<16x32xf32>
    %cst_31 = arith.constant 9.99999974E-6 : f32
    %87 = vector.broadcast %cst_31 : f32 to vector<16x1xf32>
    %88 = arith.addf %84, %87 : vector<16x1xf32>
    %89 = math.rsqrt %88 : vector<16x1xf32>
    %90 = vector.broadcast %89 : vector<16x1xf32> to vector<16x32xf32>
    %91 = arith.mulf %86, %90 : vector<16x32xf32>
    %92 = vector.broadcast %72 : vector<1x32xf32> to vector<16x32xf32>
    %93 = arith.mulf %91, %92 : vector<16x32xf32>
    %94 = vector.broadcast %73 : vector<1x32xf32> to vector<16x32xf32>
    %95 = arith.addf %93, %94 : vector<16x32xf32>
    %96 = arith.truncf %95 : vector<16x32xf32> to vector<16x32xbf16>
    %c0_32 = arith.constant 0 : index
    %c0_33 = arith.constant 0 : index
    %97 = vector.load %arg8[%c0_32, %c0_33] : memref<32x64xbf16, #tpu.memory_space<vmem>>, vector<32x64xbf16>
    %cst_34 = arith.constant dense<0.000000e+00> : vector<16x64xf32>
    %98 = tpu.matmul %96, %97, %cst_34 {dimension_numbers = #tpu.dot_dimension_numbers<[1], [0], [0], [1], [0, 0, 1, 1], [], []>} : vector<16x32xbf16>, vector<32x64xbf16>, vector<16x64xf32> -> vector<16x64xf32>
    %99 = vector.extract_strided_slice %1 {offsets = [0, 0], sizes = [1, 64], strides = [1, 1]} : vector<4x64xf32> to vector<1x64xf32>
    %100 = vector.broadcast %99 : vector<1x64xf32> to vector<16x64xf32>
    %101 = arith.addf %98, %100 : vector<16x64xf32>
    %cst_35 = arith.constant 0.000000e+00 : f32
    %102 = vector.broadcast %cst_35 : f32 to vector<16x64xf32>
    %103 = arith.maximumf %101, %102 : vector<16x64xf32>
    %104 = arith.truncf %103 : vector<16x64xf32> to vector<16x64xbf16>
    %c0_36 = arith.constant 0 : index
    %c0_37 = arith.constant 0 : index
    %105 = vector.load %arg9[%c0_36, %c0_37] : memref<64x32xbf16, #tpu.memory_space<vmem>>, vector<64x32xbf16>
    %cst_38 = arith.constant dense<0.000000e+00> : vector<16x32xf32>
    %106 = tpu.matmul %104, %105, %cst_38 {dimension_numbers = #tpu.dot_dimension_numbers<[1], [0], [0], [1], [0, 0, 1, 1], [], []>} : vector<16x64xbf16>, vector<64x32xbf16>, vector<16x32xf32> -> vector<16x32xf32>
    %107 = vector.extract_strided_slice %0 {offsets = [6, 0], sizes = [1, 32], strides = [1, 1]} : vector<9x32xf32> to vector<1x32xf32>
    %108 = vector.broadcast %107 : vector<1x32xf32> to vector<16x32xf32>
    %109 = arith.addf %106, %108 : vector<16x32xf32>
    %110 = arith.addf %95, %109 : vector<16x32xf32>
    %111 = vector.extract_strided_slice %0 {offsets = [7, 0], sizes = [1, 32], strides = [1, 1]} : vector<9x32xf32> to vector<1x32xf32>
    %112 = vector.extract_strided_slice %0 {offsets = [8, 0], sizes = [1, 32], strides = [1, 1]} : vector<9x32xf32> to vector<1x32xf32>
    %cst_39 = arith.constant dense<0.000000e+00> : vector<16xf32>
    %113 = vector.multi_reduction <add>, %110, %cst_39 [1] : vector<16x32xf32> to vector<16xf32>
    %114 = vector.shape_cast %113 : vector<16xf32> to vector<16x1xf32>
    %cst_40 = arith.constant 3.200000e+01 : f32
    %115 = vector.broadcast %cst_40 : f32 to vector<16x1xf32>
    %116 = arith.divf %114, %115 : vector<16x1xf32>
    %117 = vector.broadcast %116 : vector<16x1xf32> to vector<16x32xf32>
    %118 = arith.subf %110, %117 : vector<16x32xf32>
    %119 = arith.mulf %118, %118 : vector<16x32xf32>
    %cst_41 = arith.constant dense<0.000000e+00> : vector<16xf32>
    %120 = vector.multi_reduction <add>, %119, %cst_41 [1] : vector<16x32xf32> to vector<16xf32>
    %121 = vector.shape_cast %120 : vector<16xf32> to vector<16x1xf32>
    %cst_42 = arith.constant 3.200000e+01 : f32
    %122 = vector.broadcast %cst_42 : f32 to vector<16x1xf32>
    %123 = arith.divf %121, %122 : vector<16x1xf32>
    %124 = vector.broadcast %116 : vector<16x1xf32> to vector<16x32xf32>
    %125 = arith.subf %110, %124 : vector<16x32xf32>
    %cst_43 = arith.constant 9.99999974E-6 : f32
    %126 = vector.broadcast %cst_43 : f32 to vector<16x1xf32>
    %127 = arith.addf %123, %126 : vector<16x1xf32>
    %128 = math.rsqrt %127 : vector<16x1xf32>
    %129 = vector.broadcast %128 : vector<16x1xf32> to vector<16x32xf32>
    %130 = arith.mulf %125, %129 : vector<16x32xf32>
    %131 = vector.broadcast %111 : vector<1x32xf32> to vector<16x32xf32>
    %132 = arith.mulf %130, %131 : vector<16x32xf32>
    %133 = vector.broadcast %112 : vector<1x32xf32> to vector<16x32xf32>
    %134 = arith.addf %132, %133 : vector<16x32xf32>
    %c0_44 = arith.constant 0 : index
    %c0_45 = arith.constant 0 : index
    %c0_46 = arith.constant 0 : index
    %135 = vector.load %arg3[%c0_44, %c0_45, %c0_46] : memref<2x8x1xf32, #tpu.memory_space<vmem>>, vector<2x8x1xf32>
    %cst_47 = arith.constant dense<0.000000e+00> : vector<2x1xf32>
    %136 = vector.multi_reduction <add>, %37, %cst_47 [2] : vector<2x1x8xf32> to vector<2x1xf32>
    %cst_48 = arith.constant 1.000000e+00 : f32
    %137 = vector.broadcast %cst_48 : f32 to vector<2x1xf32>
    %138 = arith.maximumf %136, %137 : vector<2x1xf32>
    %139 = vector.shape_cast %134 : vector<16x32xf32> to vector<2x8x32xf32>
    %140 = vector.broadcast %135 : vector<2x8x1xf32> to vector<2x8x32xf32>
    %141 = arith.mulf %139, %140 : vector<2x8x32xf32>
    %cst_49 = arith.constant dense<0.000000e+00> : vector<2x32xf32>
    %142 = vector.multi_reduction <add>, %141, %cst_49 [1] : vector<2x8x32xf32> to vector<2x32xf32>
    %143 = vector.broadcast %138 : vector<2x1xf32> to vector<2x32xf32>
    %144 = arith.divf %142, %143 : vector<2x32xf32>
    %145 = arith.truncf %144 : vector<2x32xf32> to vector<2x32xbf16>
    %c0_50 = arith.constant 0 : index
    %c0_51 = arith.constant 0 : index
    %146 = vector.load %arg10[%c0_50, %c0_51] : memref<32x64xbf16, #tpu.memory_space<vmem>>, vector<32x64xbf16>
    %cst_52 = arith.constant dense<0.000000e+00> : vector<2x64xf32>
    %147 = tpu.matmul %145, %146, %cst_52 {dimension_numbers = #tpu.dot_dimension_numbers<[1], [0], [0], [1], [0, 0, 1, 1], [], []>} : vector<2x32xbf16>, vector<32x64xbf16>, vector<2x64xf32> -> vector<2x64xf32>
    %148 = vector.extract_strided_slice %1 {offsets = [1, 0], sizes = [1, 64], strides = [1, 1]} : vector<4x64xf32> to vector<1x64xf32>
    %149 = vector.broadcast %148 : vector<1x64xf32> to vector<2x64xf32>
    %150 = arith.addf %147, %149 : vector<2x64xf32>
    %cst_53 = arith.constant 0.000000e+00 : f32
    %151 = vector.broadcast %cst_53 : f32 to vector<2x64xf32>
    %152 = arith.maximumf %150, %151 : vector<2x64xf32>
    %153 = vector.extract_strided_slice %1 {offsets = [2, 0], sizes = [1, 64], strides = [1, 1]} : vector<4x64xf32> to vector<1x64xf32>
    %154 = vector.broadcast %153 : vector<1x64xf32> to vector<2x64xf32>
    %155 = arith.mulf %152, %154 : vector<2x64xf32>
    %cst_54 = arith.constant dense<0.000000e+00> : vector<2xf32>
    %156 = vector.multi_reduction <add>, %155, %cst_54 [1] : vector<2x64xf32> to vector<2xf32>
    %157 = vector.shape_cast %156 : vector<2xf32> to vector<2x1xf32>
    %158 = vector.extract_strided_slice %1 {offsets = [3, 0], sizes = [1, 1], strides = [1, 1]} : vector<4x64xf32> to vector<1x1xf32>
    %159 = vector.broadcast %158 : vector<1x1xf32> to vector<2x1xf32>
    %160 = arith.addf %157, %159 : vector<2x1xf32>
    %c0_55 = arith.constant 0 : index
    %c0_56 = arith.constant 0 : index
    %161 = vector.load %arg13[%c0_55, %c0_56] : memref<2x1xf32, #tpu.memory_space<vmem>>, vector<2x1xf32>
    tpu.vector_store %arg13[%c0_55, %c0_56], %160 {strides = array<i32>} : memref<2x1xf32, #tpu.memory_space<vmem>>, vector<2x1xf32>,
    return
  }
  func.func @transform_0(%arg0: i32) -> (i32, i32, i32) {
    %c0_i32 = arith.constant 0 : i32
    %c0_i32_0 = arith.constant 0 : i32
    %c0_i32_1 = arith.constant 0 : i32
    return %arg0, %c0_i32, %c0_i32_0 : i32, i32, i32
  }
  func.func @transform_1(%arg0: i32) -> (i32, i32, i32) {
    %c0_i32 = arith.constant 0 : i32
    %c0_i32_0 = arith.constant 0 : i32
    %c0_i32_1 = arith.constant 0 : i32
    return %arg0, %c0_i32, %c0_i32_0 : i32, i32, i32
  }
  func.func @transform_2(%arg0: i32) -> (i32, i32, i32) {
    %c0_i32 = arith.constant 0 : i32
    %c0_i32_0 = arith.constant 0 : i32
    %c0_i32_1 = arith.constant 0 : i32
    return %arg0, %c0_i32, %c0_i32_0 : i32, i32, i32
  }
  func.func @transform_3(%arg0: i32) -> (i32, i32) {
    %c0_i32 = arith.constant 0 : i32
    %c0_i32_0 = arith.constant 0 : i32
    %c0_i32_1 = arith.constant 0 : i32
    return %c0_i32, %c0_i32_0 : i32, i32
  }
  func.func @transform_4(%arg0: i32) -> (i32, i32) {
    %c0_i32 = arith.constant 0 : i32
    %c0_i32_0 = arith.constant 0 : i32
    %c0_i32_1 = arith.constant 0 : i32
    return %c0_i32, %c0_i32_0 : i32, i32
  }
  func.func @transform_5(%arg0: i32) -> (i32, i32) {
    %c0_i32 = arith.constant 0 : i32
    %c0_i32_0 = arith.constant 0 : i32
    %c0_i32_1 = arith.constant 0 : i32
    return %c0_i32, %c0_i32_0 : i32, i32
  }
  func.func @transform_6(%arg0: i32) -> (i32, i32) {
    %c0_i32 = arith.constant 0 : i32
    %c0_i32_0 = arith.constant 0 : i32
    %c0_i32_1 = arith.constant 0 : i32
    return %c0_i32, %c0_i32_0 : i32, i32
  }
  func.func @transform_7(%arg0: i32) -> (i32, i32) {
    %c0_i32 = arith.constant 0 : i32
    %c0_i32_0 = arith.constant 0 : i32
    %c0_i32_1 = arith.constant 0 : i32
    return %c0_i32, %c0_i32_0 : i32, i32
  }
  func.func @transform_8(%arg0: i32) -> (i32, i32) {
    %c0_i32 = arith.constant 0 : i32
    %c0_i32_0 = arith.constant 0 : i32
    %c0_i32_1 = arith.constant 0 : i32
    return %c0_i32, %c0_i32_0 : i32, i32
  }
  func.func @transform_9(%arg0: i32) -> (i32, i32) {
    %c0_i32 = arith.constant 0 : i32
    %c0_i32_0 = arith.constant 0 : i32
    %c0_i32_1 = arith.constant 0 : i32
    return %c0_i32, %c0_i32_0 : i32, i32
  }
  func.func @transform_10(%arg0: i32) -> (i32, i32) {
    %c0_i32 = arith.constant 0 : i32
    %c0_i32_0 = arith.constant 0 : i32
    %c0_i32_1 = arith.constant 0 : i32
    return %c0_i32, %c0_i32_0 : i32, i32
  }
  func.func @transform_11(%arg0: i32) -> (i32, i32) {
    %c0_i32 = arith.constant 0 : i32
    %c0_i32_0 = arith.constant 0 : i32
    %c0_i32_1 = arith.constant 0 : i32
    return %c0_i32, %c0_i32_0 : i32, i32
  }
  func.func @transform_12(%arg0: i32) -> (i32, i32) {
    %c0_i32 = arith.constant 0 : i32
    %c0_i32_0 = arith.constant 0 : i32
    return %arg0, %c0_i32 : i32, i32
  }
}

module attributes {stable_mosaic.version = 11 : i64} {
  func.func @reward_kernel(%arg0: i32, %arg1: memref<2x8x1xi32, #tpu.memory_space<vmem>>, %arg2: memref<2x1x8xf32, #tpu.memory_space<vmem>>, %arg3: memref<2x8x1xf32, #tpu.memory_space<vmem>>, %arg4: memref<100x32xbf16, #tpu.memory_space<vmem>>, %arg5: memref<8x32xbf16, #tpu.memory_space<vmem>>, %arg6: memref<32x96xbf16, #tpu.memory_space<vmem>>, %arg7: memref<32x32xbf16, #tpu.memory_space<vmem>>, %arg8: memref<32x64xbf16, #tpu.memory_space<vmem>>, %arg9: memref<64x32xbf16, #tpu.memory_space<vmem>>, %arg10: memref<32x64xbf16, #tpu.memory_space<vmem>>, %arg11: memref<9x32xf32, #tpu.memory_space<vmem>>, %arg12: memref<4x64xf32, #tpu.memory_space<vmem>>, %arg13: memref<2x1xf32, #tpu.memory_space<vmem>>) attributes {dimension_semantics = [#tpu.dimension_semantics<parallel>], iteration_bounds = array<i64: 1>, scalar_prefetch = 0 : i64, scratch_operands = 0 : i64, tpu.core_type = #tpu.core_type<tc>, window_params = [{transform_indices = @transform_0, window_bounds = array<i64: 2, 8, 1>}, {transform_indices = @transform_1, window_bounds = array<i64: 2, 1, 8>}, {transform_indices = @transform_2, window_bounds = array<i64: 2, 8, 1>}, {pipeline_mode = #tpu.pipeline_mode<synchronous>, transform_indices = @transform_3, window_bounds = array<i64: 100, 32>}, {pipeline_mode = #tpu.pipeline_mode<synchronous>, transform_indices = @transform_4, window_bounds = array<i64: 8, 32>}, {pipeline_mode = #tpu.pipeline_mode<synchronous>, transform_indices = @transform_5, window_bounds = array<i64: 32, 96>}, {pipeline_mode = #tpu.pipeline_mode<synchronous>, transform_indices = @transform_6, window_bounds = array<i64: 32, 32>}, {pipeline_mode = #tpu.pipeline_mode<synchronous>, transform_indices = @transform_7, window_bounds = array<i64: 32, 64>}, {pipeline_mode = #tpu.pipeline_mode<synchronous>, transform_indices = @transform_8, window_bounds = array<i64: 64, 32>}, {pipeline_mode = #tpu.pipeline_mode<synchronous>, transform_indices = @transform_9, window_bounds = array<i64: 32, 64>}, {pipeline_mode = #tpu.pipeline_mode<synchronous>, transform_indices = @transform_10, window_bounds = array<i64: 9, 32>}, {pipeline_mode = #tpu.pipeline_mode<synchronous>, transform_indices = @transform_11, window_bounds = array<i64: 4, 64>}, {transform_indices = @transform_12, window_bounds = array<i64: 2, 1>}]} {
    %c0 = arith.constant 0 : index
    %c0_0 = arith.constant 0 : index
    %0 = vector.load %arg11[%c0, %c0_0] : memref<9x32xf32, #tpu.memory_space<vmem>>, vector<9x32xf32>
    %c0_1 = arith.constant 0 : index
    %c0_2 = arith.constant 0 : index
    %1 = vector.load %arg12[%c0_1, %c0_2] : memref<4x64xf32, #tpu.memory_space<vmem>>, vector<4x64xf32>
    %c0_3 = arith.constant 0 : index
    %c0_4 = arith.constant 0 : index
    %c0_5 = arith.constant 0 : index
    %2 = vector.load %arg1[%c0_3, %c0_4, %c0_5] : memref<2x8x1xi32, #tpu.memory_space<vmem>>, vector<2x8x1xi32>
    %3 = tpu.iota {dimensions = array<i32: 2>} : vector<2x8x100xi32>
    %4 = vector.broadcast %2 : vector<2x8x1xi32> to vector<2x8x100xi32>
    %5 = arith.cmpi eq, %3, %4 : vector<2x8x100xi32>
    %6 = arith.extui %5 : vector<2x8x100xi1> to vector<2x8x100xi32>
    %7 = arith.sitofp %6 : vector<2x8x100xi32> to vector<2x8x100xf32>
    %8 = arith.truncf %7 : vector<2x8x100xf32> to vector<2x8x100xbf16>
    %9 = vector.shape_cast %8 : vector<2x8x100xbf16> to vector<16x100xbf16>
    %c0_6 = arith.constant 0 : index
    %c0_7 = arith.constant 0 : index
    %10 = vector.load %arg4[%c0_6, %c0_7] : memref<100x32xbf16, #tpu.memory_space<vmem>>, vector<100x32xbf16>
    %cst = arith.constant dense<0.000000e+00> : vector<16x32xf32>
    %11 = tpu.matmul %9, %10, %cst {dimension_numbers = #tpu.dot_dimension_numbers<[1], [0], [0], [1], [0, 0, 1, 1], [], []>} : vector<16x100xbf16>, vector<100x32xbf16>, vector<16x32xf32> -> vector<16x32xf32>
    %12 = vector.shape_cast %11 : vector<16x32xf32> to vector<2x8x32xf32>
    %c0_8 = arith.constant 0 : index
    %c0_9 = arith.constant 0 : index
    %13 = vector.load %arg5[%c0_8, %c0_9] : memref<8x32xbf16, #tpu.memory_space<vmem>>, vector<8x32xbf16>
    %14 = arith.extf %13 : vector<8x32xbf16> to vector<8x32xf32>
    %15 = vector.shape_cast %14 : vector<8x32xf32> to vector<1x8x32xf32>
    %16 = vector.broadcast %15 : vector<1x8x32xf32> to vector<2x8x32xf32>
    %17 = arith.addf %12, %16 : vector<2x8x32xf32>
    %18 = vector.shape_cast %17 : vector<2x8x32xf32> to vector<16x32xf32>
    %19 = arith.truncf %18 : vector<16x32xf32> to vector<16x32xbf16>
    %c0_10 = arith.constant 0 : index
    %c0_11 = arith.constant 0 : index
    %20 = vector.load %arg6[%c0_10, %c0_11] : memref<32x96xbf16, #tpu.memory_space<vmem>>, vector<32x96xbf16>
    %cst_12 = arith.constant dense<0.000000e+00> : vector<16x96xf32>
    %21 = tpu.matmul %19, %20, %cst_12 {dimension_numbers = #tpu.dot_dimension_numbers<[1], [0], [0], [1], [0, 0, 1, 1], [], []>} : vector<16x32xbf16>, vector<32x96xbf16>, vector<16x96xf32> -> vector<16x96xf32>
    %22 = vector.extract_strided_slice %21 {offsets = [0, 0], sizes = [16, 32], strides = [1, 1]} : vector<16x96xf32> to vector<16x32xf32>
    %23 = vector.extract_strided_slice %0 {offsets = [0, 0], sizes = [1, 32], strides = [1, 1]} : vector<9x32xf32> to vector<1x32xf32>
    %24 = vector.broadcast %23 : vector<1x32xf32> to vector<16x32xf32>
    %25 = arith.addf %22, %24 : vector<16x32xf32>
    %26 = vector.shape_cast %25 : vector<16x32xf32> to vector<2x8x32xf32>
    %27 = vector.extract_strided_slice %21 {offsets = [0, 32], sizes = [16, 32], strides = [1, 1]} : vector<16x96xf32> to vector<16x32xf32>
    %28 = vector.extract_strided_slice %0 {offsets = [1, 0], sizes = [1, 32], strides = [1, 1]} : vector<9x32xf32> to vector<1x32xf32>
    %29 = vector.broadcast %28 : vector<1x32xf32> to vector<16x32xf32>
    %30 = arith.addf %27, %29 : vector<16x32xf32>
    %31 = vector.shape_cast %30 : vector<16x32xf32> to vector<2x8x32xf32>
    %32 = vector.extract_strided_slice %21 {offsets = [0, 64], sizes = [16, 32], strides = [1, 1]} : vector<16x96xf32> to vector<16x32xf32>
    %33 = vector.extract_strided_slice %0 {offsets = [2, 0], sizes = [1, 32], strides = [1, 1]} : vector<9x32xf32> to vector<1x32xf32>
    %34 = vector.broadcast %33 : vector<1x32xf32> to vector<16x32xf32>
    %35 = arith.addf %32, %34 : vector<16x32xf32>
    %36 = vector.shape_cast %35 : vector<16x32xf32> to vector<2x8x32xf32>
    %c0_13 = arith.constant 0 : index
    %c0_14 = arith.constant 0 : index
    %c0_15 = arith.constant 0 : index
    %37 = vector.load %arg2[%c0_13, %c0_14, %c0_15] : memref<2x1x8xf32, #tpu.memory_space<vmem>>, vector<2x1x8xf32>
    %cst_16 = arith.constant 3.200000e+01 : f32
    %38 = math.sqrt %cst_16 : f32
    %cst_17 = arith.constant 1.000000e+00 : f32
    %39 = arith.divf %cst_17, %38 : f32
    %40 = arith.truncf %26 : vector<2x8x32xf32> to vector<2x8x32xbf16>
    %41 = arith.truncf %31 : vector<2x8x32xf32> to vector<2x8x32xbf16>
    "tpu.trace_start"() <{level = 10 : i32, message = "bqd,bkd->bqk"}> : () -> ()
    %cst_18 = arith.constant dense<0.000000e+00> : vector<2x8x8xf32>
    %42 = tpu.matmul %40, %41, %cst_18 {dimension_numbers = #tpu.dot_dimension_numbers<[2], [2], [1], [1], [0, 0, 0, 1, 1, 1], [0], [0]>} : vector<2x8x32xbf16>, vector<2x8x32xbf16>, vector<2x8x8xf32> -> vector<2x8x8xf32>
    "tpu.trace_stop"() : () -> ()
    %43 = vector.broadcast %39 : f32 to vector<2x8x8xf32>
    %44 = arith.mulf %42, %43 : vector<2x8x8xf32>
    %cst_19 = arith.constant 1.000000e+00 : f32
    %45 = vector.broadcast %cst_19 : f32 to vector<2x1x8xf32>
    %46 = arith.subf %37, %45 : vector<2x1x8xf32>
    %cst_20 = arith.constant 1.000000e+09 : f32
    %47 = vector.broadcast %cst_20 : f32 to vector<2x1x8xf32>
    %48 = arith.mulf %46, %47 : vector<2x1x8xf32>
    %49 = vector.broadcast %48 : vector<2x1x8xf32> to vector<2x8x8xf32>
    %50 = arith.addf %44, %49 : vector<2x8x8xf32>
    %cst_21 = arith.constant dense<0xFF800000> : vector<2x8xf32>
    %51 = vector.multi_reduction <maximumf>, %50, %cst_21 [2] : vector<2x8x8xf32> to vector<2x8xf32>
    %52 = vector.shape_cast %51 : vector<2x8xf32> to vector<2x8x1xf32>
    %53 = vector.broadcast %52 : vector<2x8x1xf32> to vector<2x8x8xf32>
    %54 = arith.subf %50, %53 : vector<2x8x8xf32>
    %55 = math.exp %54 : vector<2x8x8xf32>
    %cst_22 = arith.constant dense<0.000000e+00> : vector<2x8xf32>
    %56 = vector.multi_reduction <add>, %55, %cst_22 [2] : vector<2x8x8xf32> to vector<2x8xf32>
    %57 = vector.shape_cast %56 : vector<2x8xf32> to vector<2x8x1xf32>
    %58 = tpu.reciprocal %57 {approx = true} : vector<2x8x1xf32> -> vector<2x8x1xf32>
    %59 = vector.broadcast %58 : vector<2x8x1xf32> to vector<2x8x8xf32>
    %60 = arith.mulf %55, %59 : vector<2x8x8xf32>
    %61 = arith.truncf %60 : vector<2x8x8xf32> to vector<2x8x8xbf16>
    %62 = arith.truncf %36 : vector<2x8x32xf32> to vector<2x8x32xbf16>
    "tpu.trace_start"() <{level = 10 : i32, message = "bqk,bkd->bqd"}> : () -> ()
    %cst_23 = arith.constant dense<0.000000e+00> : vector<2x8x32xf32>
    %63 = tpu.matmul %61, %62, %cst_23 {dimension_numbers = #tpu.dot_dimension_numbers<[2], [1], [1], [2], [0, 0, 0, 1, 1, 2], [0], [0]>} : vector<2x8x8xbf16>, vector<2x8x32xbf16>, vector<2x8x32xf32> -> vector<2x8x32xf32>
    "tpu.trace_stop"() : () -> ()
    %64 = vector.shape_cast %63 : vector<2x8x32xf32> to vector<16x32xf32>
    %65 = arith.truncf %64 : vector<16x32xf32> to vector<16x32xbf16>
    %c0_24 = arith.constant 0 : index
    %c0_25 = arith.constant 0 : index
    %66 = vector.load %arg7[%c0_24, %c0_25] : memref<32x32xbf16, #tpu.memory_space<vmem>>, vector<32x32xbf16>
    %cst_26 = arith.constant dense<0.000000e+00> : vector<16x32xf32>
    %67 = tpu.matmul %65, %66, %cst_26 {dimension_numbers = #tpu.dot_dimension_numbers<[1], [0], [0], [1], [0, 0, 1, 1], [], []>} : vector<16x32xbf16>, vector<32x32xbf16>, vector<16x32xf32> -> vector<16x32xf32>
    %68 = vector.extract_strided_slice %0 {offsets = [3, 0], sizes = [1, 32], strides = [1, 1]} : vector<9x32xf32> to vector<1x32xf32>
    %69 = vector.broadcast %68 : vector<1x32xf32> to vector<16x32xf32>
    %70 = arith.addf %67, %69 : vector<16x32xf32>
    %71 = arith.addf %18, %70 : vector<16x32xf32>
    %72 = vector.extract_strided_slice %0 {offsets = [4, 0], sizes = [1, 32], strides = [1, 1]} : vector<9x32xf32> to vector<1x32xf32>
    %73 = vector.extract_strided_slice %0 {offsets = [5, 0], sizes = [1, 32], strides = [1, 1]} : vector<9x32xf32> to vector<1x32xf32>
    %cst_27 = arith.constant dense<0.000000e+00> : vector<16xf32>
    %74 = vector.multi_reduction <add>, %71, %cst_27 [1] : vector<16x32xf32> to vector<16xf32>
    %75 = vector.shape_cast %74 : vector<16xf32> to vector<16x1xf32>
    %cst_28 = arith.constant 3.200000e+01 : f32
    %76 = vector.broadcast %cst_28 : f32 to vector<16x1xf32>
    %77 = arith.divf %75, %76 : vector<16x1xf32>
    %78 = vector.broadcast %77 : vector<16x1xf32> to vector<16x32xf32>
    %79 = arith.subf %71, %78 : vector<16x32xf32>
    %80 = arith.mulf %79, %79 : vector<16x32xf32>
    %cst_29 = arith.constant dense<0.000000e+00> : vector<16xf32>
    %81 = vector.multi_reduction <add>, %80, %cst_29 [1] : vector<16x32xf32> to vector<16xf32>
    %82 = vector.shape_cast %81 : vector<16xf32> to vector<16x1xf32>
    %cst_30 = arith.constant 3.200000e+01 : f32
    %83 = vector.broadcast %cst_30 : f32 to vector<16x1xf32>
    %84 = arith.divf %82, %83 : vector<16x1xf32>
    %85 = vector.broadcast %77 : vector<16x1xf32> to vector<16x32xf32>
    %86 = arith.subf %71, %85 : vector<16x32xf32>
    %cst_31 = arith.constant 9.99999974E-6 : f32
    %87 = vector.broadcast %cst_31 : f32 to vector<16x1xf32>
    %88 = arith.addf %84, %87 : vector<16x1xf32>
    %89 = math.rsqrt %88 : vector<16x1xf32>
    %90 = vector.broadcast %89 : vector<16x1xf32> to vector<16x32xf32>
    %91 = arith.mulf %86, %90 : vector<16x32xf32>
    %92 = vector.broadcast %72 : vector<1x32xf32> to vector<16x32xf32>
    %93 = arith.mulf %91, %92 : vector<16x32xf32>
    %94 = vector.broadcast %73 : vector<1x32xf32> to vector<16x32xf32>
    %95 = arith.addf %93, %94 : vector<16x32xf32>
    %96 = arith.truncf %95 : vector<16x32xf32> to vector<16x32xbf16>
    %c0_32 = arith.constant 0 : index
    %c0_33 = arith.constant 0 : index
    %97 = vector.load %arg8[%c0_32, %c0_33] : memref<32x64xbf16, #tpu.memory_space<vmem>>, vector<32x64xbf16>
    %cst_34 = arith.constant dense<0.000000e+00> : vector<16x64xf32>
    %98 = tpu.matmul %96, %97, %cst_34 {dimension_numbers = #tpu.dot_dimension_numbers<[1], [0], [0], [1], [0, 0, 1, 1], [], []>} : vector<16x32xbf16>, vector<32x64xbf16>, vector<16x64xf32> -> vector<16x64xf32>
    %99 = vector.extract_strided_slice %1 {offsets = [0, 0], sizes = [1, 64], strides = [1, 1]} : vector<4x64xf32> to vector<1x64xf32>
    %100 = vector.broadcast %99 : vector<1x64xf32> to vector<16x64xf32>
    %101 = arith.addf %98, %100 : vector<16x64xf32>
    %cst_35 = arith.constant 0.000000e+00 : f32
    %102 = vector.broadcast %cst_35 : f32 to vector<16x64xf32>
    %103 = arith.maximumf %101, %102 : vector<16x64xf32>
    %104 = arith.truncf %103 : vector<16x64xf32> to vector<16x64xbf16>
    %c0_36 = arith.constant 0 : index
    %c0_37 = arith.constant 0 : index
    %105 = vector.load %arg9[%c0_36, %c0_37] : memref<64x32xbf16, #tpu.memory_space<vmem>>, vector<64x32xbf16>
    %cst_38 = arith.constant dense<0.000000e+00> : vector<16x32xf32>
    %106 = tpu.matmul %104, %105, %cst_38 {dimension_numbers = #tpu.dot_dimension_numbers<[1], [0], [0], [1], [0, 0, 1, 1], [], []>} : vector<16x64xbf16>, vector<64x32xbf16>, vector<16x32xf32> -> vector<16x32xf32>
    %107 = vector.extract_strided_slice %0 {offsets = [6, 0], sizes = [1, 32], strides = [1, 1]} : vector<9x32xf32> to vector<1x32xf32>
    %108 = vector.broadcast %107 : vector<1x32xf32> to vector<16x32xf32>
    %109 = arith.addf %106, %108 : vector<16x32xf32>
    %110 = arith.addf %95, %109 : vector<16x32xf32>
    %111 = vector.extract_strided_slice %0 {offsets = [7, 0], sizes = [1, 32], strides = [1, 1]} : vector<9x32xf32> to vector<1x32xf32>
    %112 = vector.extract_strided_slice %0 {offsets = [8, 0], sizes = [1, 32], strides = [1, 1]} : vector<9x32xf32> to vector<1x32xf32>
    %cst_39 = arith.constant dense<0.000000e+00> : vector<16xf32>
    %113 = vector.multi_reduction <add>, %110, %cst_39 [1] : vector<16x32xf32> to vector<16xf32>
    %114 = vector.shape_cast %113 : vector<16xf32> to vector<16x1xf32>
    %cst_40 = arith.constant 3.200000e+01 : f32
    %115 = vector.broadcast %cst_40 : f32 to vector<16x1xf32>
    %116 = arith.divf %114, %115 : vector<16x1xf32>
    %117 = vector.broadcast %116 : vector<16x1xf32> to vector<16x32xf32>
    %118 = arith.subf %110, %117 : vector<16x32xf32>
    %119 = arith.mulf %118, %118 : vector<16x32xf32>
    %cst_41 = arith.constant dense<0.000000e+00> : vector<16xf32>
    %120 = vector.multi_reduction <add>, %119, %cst_41 [1] : vector<16x32xf32> to vector<16xf32>
    %121 = vector.shape_cast %120 : vector<16xf32> to vector<16x1xf32>
    %cst_42 = arith.constant 3.200000e+01 : f32
    %122 = vector.broadcast %cst_42 : f32 to vector<16x1xf32>
    %123 = arith.divf %121, %122 : vector<16x1xf32>
    %124 = vector.broadcast %116 : vector<16x1xf32> to vector<16x32xf32>
    %125 = arith.subf %110, %124 : vector<16x32xf32>
    %cst_43 = arith.constant 9.99999974E-6 : f32
    %126 = vector.broadcast %cst_43 : f32 to vector<16x1xf32>
    %127 = arith.addf %123, %126 : vector<16x1xf32>
    %128 = math.rsqrt %127 : vector<16x1xf32>
    %129 = vector.broadcast %128 : vector<16x1xf32> to vector<16x32xf32>
    %130 = arith.mulf %125, %129 : vector<16x32xf32>
    %131 = vector.broadcast %111 : vector<1x32xf32> to vector<16x32xf32>
    %132 = arith.mulf %130, %131 : vector<16x32xf32>
    %133 = vector.broadcast %112 : vector<1x32xf32> to vector<16x32xf32>
    %134 = arith.addf %132, %133 : vector<16x32xf32>
    %c0_44 = arith.constant 0 : index
    %c0_45 = arith.constant 0 : index
    %c0_46 = arith.constant 0 : index
    %135 = vector.load %arg3[%c0_44, %c0_45, %c0_46] : memref<2x8x1xf32, #tpu.memory_space<vmem>>, vector<2x8x1xf32>
    %cst_47 = arith.constant dense<0.000000e+00> : vector<2x1xf32>
    %136 = vector.multi_reduction <add>, %37, %cst_47 [2] : vector<2x1x8xf32> to vector<2x1xf32>
    %cst_48 = arith.constant 1.000000e+00 : f32
    %137 = vector.broadcast %cst_48 : f32 to vector<2x1xf32>
    %138 = arith.maximumf %136, %137 : vector<2x1xf32>
    %139 = vector.shape_cast %134 : vector<16x32xf32> to vector<2x8x32xf32>
    %140 = vector.broadcast %135 : vector<2x8x1xf32> to vector<2x8x32xf32>
    %141 = arith.mulf %139, %140 : vector<2x8x32xf32>
    %cst_49 = arith.constant dense<0.000000e+00> : vector<2x32xf32>
    %142 = vector.multi_reduction <add>, %141, %cst_49 [1] : vector<2x8x32xf32> to vector<2x32xf32>
    %143 = vector.broadcast %138 : vector<2x1xf32> to vector<2x32xf32>
    %144 = arith.divf %142, %143 : vector<2x32xf32>
    %145 = arith.truncf %144 : vector<2x32xf32> to vector<2x32xbf16>
    %c0_50 = arith.constant 0 : index
    %c0_51 = arith.constant 0 : index
    %146 = vector.load %arg10[%c0_50, %c0_51] : memref<32x64xbf16, #tpu.memory_space<vmem>>, vector<32x64xbf16>
    %cst_52 = arith.constant dense<0.000000e+00> : vector<2x64xf32>
    %147 = tpu.matmul %145, %146, %cst_52 {dimension_numbers = #tpu.dot_dimension_numbers<[1], [0], [0], [1], [0, 0, 1, 1], [], []>} : vector<2x32xbf16>, vector<32x64xbf16>, vector<2x64xf32> -> vector<2x64xf32>
    %148 = vector.extract_strided_slice %1 {offsets = [1, 0], sizes = [1, 64], strides = [1, 1]} : vector<4x64xf32> to vector<1x64xf32>
    %149 = vector.broadcast %148 : vector<1x64xf32> to vector<2x64xf32>
    %150 = arith.addf %147, %149 : vector<2x64xf32>
    %cst_53 = arith.constant 0.000000e+00 : f32
    %151 = vector.broadcast %cst_53 : f32 to vector<2x64xf32>
    %152 = arith.maximumf %150, %151 : vector<2x64xf32>
    %153 = vector.extract_strided_slice %1 {offsets = [2, 0], sizes = [1, 64], strides = [1, 1]} : vector<4x64xf32> to vector<1x64xf32>
    %154 = vector.broadcast %153 : vector<1x64xf32> to vector<2x64xf32>
    %155 = arith.mulf %152, %154 : vector<2x64xf32>
    %cst_54 = arith.constant dense<0.000000e+00> : vector<2xf32>
    %156 = vector.multi_reduction <add>, %155, %cst_54 [1] : vector<2x64xf32> to vector<2xf32>
    %157 = vector.shape_cast %156 : vector<2xf32> to vector<2x1xf32>
    %158 = vector.extract_strided_slice %1 {offsets = [3, 0], sizes = [1, 1], strides = [1, 1]} : vector<4x64xf32> to vector<1x1xf32>
    %159 = vector.broadcast %158 : vector<1x1xf32> to vector<2x1xf32>
    %160 = arith.addf %157, %159 : vector<2x1xf32>
    %c0_55 = arith.constant 0 : index
    %c0_56 = arith.constant 0 : index
    %161 = vector.load %arg13[%c0_55, %c0_56] : memref<2x1xf32, #tpu.memory_space<vmem>>, vector<2x1xf32>
    tpu.vector_store %arg13[%c0_55, %c0_56], %160 {strides = array<i32>} : memref<2x1xf32, #tpu.memory_space<vmem>>, vector<2x1xf32>,
    return
  }
  func.func @transform_0(%arg0: i32) -> (i32, i32, i32) {
    %c0_i32 = arith.constant 0 : i32
    %c0_i32_0 = arith.constant 0 : i32
    %c0_i32_1 = arith.constant 0 : i32
    return %arg0, %c0_i32, %c0_i32_0 : i32, i32, i32
  }
  func.func @transform_1(%arg0: i32) -> (i32, i32, i32) {
    %c0_i32 = arith.constant 0 : i32
    %c0_i32_0 = arith.constant 0 : i32
    %c0_i32_1 = arith.constant 0 : i32
    return %arg0, %c0_i32, %c0_i32_0 : i32, i32, i32
  }
  func.func @transform_2(%arg0: i32) -> (i32, i32, i32) {
    %c0_i32 = arith.constant 0 : i32
    %c0_i32_0 = arith.constant 0 : i32
    %c0_i32_1 = arith.constant 0 : i32
    return %arg0, %c0_i32, %c0_i32_0 : i32, i32, i32
  }
  func.func @transform_3(%arg0: i32) -> (i32, i32) {
    %c0_i32 = arith.constant 0 : i32
    %c0_i32_0 = arith.constant 0 : i32
    %c0_i32_1 = arith.constant 0 : i32
    return %c0_i32, %c0_i32_0 : i32, i32
  }
  func.func @transform_4(%arg0: i32) -> (i32, i32) {
    %c0_i32 = arith.constant 0 : i32
    %c0_i32_0 = arith.constant 0 : i32
    %c0_i32_1 = arith.constant 0 : i32
    return %c0_i32, %c0_i32_0 : i32, i32
  }
  func.func @transform_5(%arg0: i32) -> (i32, i32) {
    %c0_i32 = arith.constant 0 : i32
    %c0_i32_0 = arith.constant 0 : i32
    %c0_i32_1 = arith.constant 0 : i32
    return %c0_i32, %c0_i32_0 : i32, i32
  }
  func.func @transform_6(%arg0: i32) -> (i32, i32) {
    %c0_i32 = arith.constant 0 : i32
    %c0_i32_0 = arith.constant 0 : i32
    %c0_i32_1 = arith.constant 0 : i32
    return %c0_i32, %c0_i32_0 : i32, i32
  }
  func.func @transform_7(%arg0: i32) -> (i32, i32) {
    %c0_i32 = arith.constant 0 : i32
    %c0_i32_0 = arith.constant 0 : i32
    %c0_i32_1 = arith.constant 0 : i32
    return %c0_i32, %c0_i32_0 : i32, i32
  }
  func.func @transform_8(%arg0: i32) -> (i32, i32) {
    %c0_i32 = arith.constant 0 : i32
    %c0_i32_0 = arith.constant 0 : i32
    %c0_i32_1 = arith.constant 0 : i32
    return %c0_i32, %c0_i32_0 : i32, i32
  }
  func.func @transform_9(%arg0: i32) -> (i32, i32) {
    %c0_i32 = arith.constant 0 : i32
    %c0_i32_0 = arith.constant 0 : i32
    %c0_i32_1 = arith.constant 0 : i32
    return %c0_i32, %c0_i32_0 : i32, i32
  }
  func.func @transform_10(%arg0: i32) -> (i32, i32) {
    %c0_i32 = arith.constant 0 : i32
    %c0_i32_0 = arith.constant 0 : i32
    %c0_i32_1 = arith.constant 0 : i32
    return %c0_i32, %c0_i32_0 : i32, i32
  }
  func.func @transform_11(%arg0: i32) -> (i32, i32) {
    %c0_i32 = arith.constant 0 : i32
    %c0_i32_0 = arith.constant 0 : i32
    %c0_i32_1 = arith.constant 0 : i32
    return %c0_i32, %c0_i32_0 : i32, i32
  }
  func.func @transform_12(%arg0: i32) -> (i32, i32) {
    %c0_i32 = arith.constant 0 : i32
    %c0_i32_0 = arith.constant 0 : i32
    return %arg0, %c0_i32 : i32, i32
  }
}

</mosaic_0001>

<bundles_post_ra>
// kernel: tpu_custom_call.1
= control target key start
LH: loop header
LB: loop body
LE: loop exit
PB: predicated region body
PF: predicated region fallthrough
CT: control target
= control target key end

     0   :  { %v1150_v0 = vmov 0   ;;  %v1151_v2 = vmov 0.0   ;;  %vm124_vm0 = vcmask 1041408   ;;  %vm1152_vm1 = vmmov 0   ;;  %s1153_s25 = smov 32   ;;  %s1452_s0 = inlined_call_operand.vmem [shape: s32[2,8,1], index: 0, kind: input, shape index: {}]   ;;  %s1453_s3 = inlined_call_operand.vmem [shape: bf16[100,32], index: 3, kind: input, shape index: {}]   ;;  %s1454_s5 = inlined_call_operand.vmem [shape: bf16[32,96], index: 5, kind: input, shape index: {}]   ;;  %s1455_s10 = inlined_call_operand.vmem [shape: f32[9,32], index: 10, kind: input, shape index: {}]   ;;  %s1456_s4 = inlined_call_operand.vmem [shape: bf16[8,32], index: 4, kind: input, shape index: {}]   ;;  %s1457_s1 = inlined_call_operand.vmem [shape: f32[2,1,8], index: 1, kind: input, shape index: {}]   ;;  %s1458_s6 = inlined_call_operand.vmem [shape: bf16[32,32], index: 6, kind: input, shape index: {}]   ;;  %s1459_s7 = inlined_call_operand.vmem [shape: bf16[32,64], index: 7, kind: input, shape index: {}]   ;;  %s1460_s8 = inlined_call_operand.vmem [shape: bf16[64,32], index: 8, kind: input, shape index: {}]   ;;  %s1461_s11 = inlined_call_operand.vmem [shape: f32[4,64], index: 11, kind: input, shape index: {}]   ;;  %s1462_s2 = inlined_call_operand.vmem [shape: f32[2,8,1], index: 2, kind: input, shape index: {}]   ;;  %s1463_s9 = inlined_call_operand.vmem [shape: bf16[32,64], index: 9, kind: input, shape index: {}]   ;;  %s1464_s12 = inlined_call_operand.vmem [shape: f32[2,1], index: 12, kind: output, shape index: {}]  }
   0x1   :  { %1109 = vset.pattern.permute.xlu0 %v1150_v0  ;;  %v45_v1 = vld [vmem:[%s1452_s0] sm:$0xff]  ;;  %1017 = vmatprep.subr.bf16.mxu0 %v1151_v2  ;;  %v46_v3 = vld [vmem:[%s1452_s0 + $0x8] sm:$0xff]  ;;  %v1111_v4 = vld [vmem:[%s1453_s3 + $0x30] ss:$0 sps:$4 sm:$0x33]   ;;  %v47_v12 = vlaneseq  ;;  %vm120_vm4 = vcmask 818176  }
   0x2   :  { %50 = vperm.xlu0 %1109, %v45_v1   ;;  %1035 = vmatprep.subr.bf16.mxu1 %v1151_v2  ;;  %v126_v5 = vsel %vm124_vm0, %v1111_v4, 0  ;;  %v1112_v6 = vld [vmem:[%s1453_s3 + $0x28] sm:$0xff]   ;;  %v1113_v7 = vld [vmem:[%s1453_s3 + $0x20] sm:$0xff]   ;;  %v1114_v8 = vld [vmem:[%s1453_s3 + $0x18] sm:$0xff]   ;;  %vm190_vm5 = vcmask 261120   ;;  %vm385_vm6 = vcmask 64512  }
   0x3   :  { %1110 = vset.pattern.permute.xlu1 %v1150_v0  ;;  %1018 = vmatpush3.bf16.msra.mxu0 %v126_v5  ;;  %v1115_v9 = vld [vmem:[%s1453_s3 + $0x10] sm:$0xff]   ;;  %v1116_v10 = vld [vmem:[%s1453_s3 + $0x8] sm:$0xff]   ;;  %v1117_v11 = vld [vmem:[%s1453_s3] sm:$0xff]   ;;  %v48_v13 = vand.u32 127, %v47_v12  ;;  %v1272_v21 = vshrl.u32 %v47_v12, 7  ;;  %vm418_vm7 = vcmask 1043456  }
   0x4   :  { %1019 = vmatprep.subr.bf16.mxu0 %v1151_v2  ;;  %1031 = vmatprep.mubr.msk.bf16.mxu0 %vm1152_vm1, %v1151_v2  ;;  %v1118_v19 = vld [vmem:[%s1454_s5 + $0x8] sm:$0xff]   ;;  %v1119_v20 = vld [vmem:[%s1454_s5] sm:$0xff]   ;;  %vm721_vm8 = vcmask 523264   ;;  %vm808_vm9 = vcmask 57344   ;;  %vm869_vm10 = vcmask 1041409   ;;  %vm933_vm11 = vcmask 517120  }
   0x5   :  { %1039 = vmatprep.mubr.msk.bf16.mxu1 %vm1152_vm1, %v1151_v2  ;;  %1036 = vmatpush3.bf16.msra.mxu1 %v1118_v19  ;;  %v243_v22 = vsub.s32 1, %v1272_v21  ;;  %v1279_v23 = vld [vmem:[%s1455_s10] sm:$0xff]  ;;  %v1303_v43 = vsub.s32 0, %v1272_v21  ;;  %v253_v12 = vsub.s32 2, %v1272_v21  ;;  %vm942_vm12 = vcmask 1024  }
   0x6   :  { %53 = vperm.xlu0 %1109, %v46_v3   ;;  %1037 = vmatprep.subr.bf16.mxu1 %v1151_v2  ;;  %v169_v25 = vld [vmem:[%s1456_s4] sm:$0xf]  ;;  %s1154_s4 = smov 96  }
   0x7   :  { %1020 = vmatpush3.bf16.msra.mxu0 %v1112_v6  ;;  %v244_v24 = vrot.slane %v1279_v23, %v243_v22  ;;  %v170_v27 = vunpack.c.l.bf16 %v169_v25  ;;  %v238_v44 = vrot.slane %v1279_v23, %v1303_v43  ;;  %v1322_v53 = vld [vmem:[%s1457_s1] sm:$0x1]  ;;  %v1328_v56 = vld [vmem:[%s1457_s1 + $0x1] sm:$0x1]  ;;  %s1155_s1 = smov 64  }
   0x8   :  { %1021 = vmatprep.subr.bf16.mxu0 %v1151_v2  ;;  %v964_v54 = vadd.f32 -1.0, %v1322_v53  ;;  %v965_v58 = vadd.f32 -1.0, %v1328_v56 }
   0x9   :  { %1038 = vmatpush3.bf16.msra.mxu1 %v1119_v20  ;;  %246 = vrot.lane.b32.xlu1 %v244_v24, %s1153_s25 }
   0xa   :  { %1043 = vmatprep.subr.bf16.mxu1 %v1151_v2  ;;  %v369_v55 = vmul.f32 1e+09, %v964_v54  ;;  %v370_v63 = vmul.f32 1e+09, %v965_v58 }
   0xb   :  { %1022 = vmatpush3.bf16.msra.mxu0 %v1113_v7 }
   0xc   :  { %1023 = vmatprep.subr.bf16.mxu0 %v1151_v2  ;;  %v376_v57 = vrot.slane %v369_v55, %v1303_v43  ;;  %v380_v4 = vrot.slane %v370_v63, %v1303_v43 }
   0xf   :  { %1024 = vmatpush3.bf16.msra.mxu0 %v1114_v8 }
  0x10   :  { %1025 = vmatprep.subr.bf16.mxu0 %v1151_v2 }
  0x13   :  { %1026 = vmatpush3.bf16.msra.mxu0 %v1115_v9 }
  0x14   :  { %1027 = vmatprep.subr.bf16.mxu0 %v1151_v2 }
  0x17   :  { %1028 = vmatpush3.bf16.msra.mxu0 %v1116_v10 }
  0x18   :  { %1029 = vmatprep.subr.bf16.mxu0 %v1151_v2 }
  0x1b   :  { %1030 = vmatpush3.bf16.msra.mxu0 %v1117_v11 }
  0x1c   :  { %1061 = vmatprep.subr.bf16.mxu0 %v1151_v2 }
  0x7b   :  { %v247_v34 = vpop.permute.xlu1 %246 }
  0x7d   :  { %v51_v14 = vpop.permute.xlu0 %50 }
  0x7e   :  { %vm55_vm2 = vcmp.eq.s32.totalorder %v48_v13, %v51_v14 }
  0x7f   :  { %v948_v16 = vsel %vm55_vm2, 1.0, %v1151_v2 }
  0x81   :  { %v54_v15 = vpop.permute.xlu0 %53 }
  0x82   :  { %vm56_vm3 = vcmp.eq.s32.totalorder %v48_v13, %v54_v15  ;;  %v254_v13 = vrot.slane %v1279_v23, %v253_v12 }
  0x83   :  { %v949_v17 = vsel %vm56_vm3, 1.0, %v1151_v2 }
  0x84   :  { %v983_v18 = vpack.c.bf16 %v949_v17, %v948_v16 }
  0x86   :  { %1032 = vmatmul.mubr.msk.bf16.vlgmr.msra.gmra.mxu0 %vm120_vm4, %v983_v18 }
  0x87   :  { %1063 = vmatprep.mubr.msk.bf16.mxu0 %vm1152_vm1, %v1151_v2 }
 0x146   :  { %v162_v26 = vpop.f32.mrf.mxu0 }
 0x147   :  { %v1287_v30 = vadd.f32 %v170_v27, %v162_v26 }
 0x148   :  { %v1033_v28 = vpop.f32.mrf.mxu0 }
 0x14a   :  { %v165_v29 = vpop.f32.mrf.mxu0 }
 0x14b   :  { %v1289_v31 = vadd.f32 %v170_v27, %v165_v29 }
 0x14c   :  { %v1034_v32 = vpop.f32.mrf.mxu0 }
 0x14d   :  { %v173_v33 = vpack.c.bf16 %v1289_v31, %v1287_v30 }
 0x14f   :  { %1040 = vmatmul.mubr.msk.bf16.vlgmr.msra.gmra.mxu1 %vm190_vm5, %v173_v33 }
 0x150   :  { %1045 = vmatprep.mubr.msk.bf16.mxu1 %vm1152_vm1, %v1151_v2 }
 0x20f   :  { %v1296_v35 = vpop.f32.mrf.mxu1 }
 0x210   :  { %v249_v36 = vadd.f32 %v247_v34, %v1296_v35  ;;  %v239_v47 = vadd.f32 %v238_v44, %v1296_v35 }
 0x211   :  { %v1041_v37 = vpop.f32.mrf.mxu1 }
 0x212   :  { %v265_v38 = vpack.c.bf16 %v249_v36, %v249_v36  ;;  %v263_v49 = vpack.c.bf16 %v239_v47, %v239_v47  ;;  %v1120_v47 = vld [vmem:[%s1458_s6 + $0x8] sm:$0xff]  }
 0x213   :  { %v1299_v39 = vpop.f32.mrf.mxu1 }
 0x214   :  { %v250_v40 = vadd.f32 %v247_v34, %v1299_v39  ;;  %268 = vrot.lane.b32.xlu1 %v265_v38, %s1154_s4  ;;  %v240_v51 = vadd.f32 %v238_v44, %v1299_v39 }
 0x215   :  { %v1042_v41 = vpop.f32.mrf.mxu1 }
 0x216   :  { %v266_v42 = vpack.c.bf16 %v250_v40, %v250_v40  ;;  %v264_v52 = vpack.c.bf16 %v240_v51, %v240_v51 }
 0x218   :  { %317 = vrot.lane.b32.xlu0 %v266_v42, %s1154_s4 }
 0x286   :  { %v269_v45 = vpop.permute.xlu1 %268 }
 0x287   :  { %v274_v46 = vsel %vm190_vm5, %v269_v45, 0 }
 0x288   :  { %1044 = vmatpush3.bf16.xpose.msra.mxu1 %v274_v46 }
 0x289   :  { %1049 = vmatprep.subr.bf16.mxu1 %v1151_v2 }
 0x28a   :  { %v318_v48 = vpop.permute.xlu0 %317 }
 0x28b   :  { %v323_v50 = vsel %vm190_vm5, %v318_v48, 0  ;;  %v1121_v48 = vld [vmem:[%s1458_s6] sm:$0xff]  }
 0x28f   :  { %1046 = vmatmul.mubr.msk.bf16.vlgmr.msra.gmra.mxu1 %vm190_vm5, %v263_v49 }
 0x290   :  { %1050 = vmatpush3.bf16.xpose.msra.mxu1 %v323_v50  ;;  %1051 = vmatprep.mubr.msk.bf16.mxu1 %vm1152_vm1, %v1151_v2 }
 0x291   :  { %1055 = vmatprep.subr.bf16.mxu1 %v1151_v2 }
 0x297   :  { %1052 = vmatmul.mubr.msk.bf16.vlgmr.msra.gmra.mxu1 %vm190_vm5, %v264_v52 }
 0x298   :  { %1057 = vmatprep.mubr.msk.bf16.mxu1 %vm1152_vm1, %v1151_v2 }
 0x34f   :  { %v310_v59 = vpop.f32.mrf.mxu1 }
 0x350   :  { %v365_v60 = vmul.f32 0.17677669, %v310_v59 }
 0x351   :  { %v1047_v61 = vpop.f32.mrf.mxu1 }
 0x352   :  { %v383_v62 = vadd.f32 %v376_v57, %v365_v60  ;;  %v518_v60 = vsub.s32 3, %v1272_v21 }
 0x353   :  { %v313_v0 = vpop.f32.mrf.mxu1 }
 0x354   :  { %v386_v1 = vsel %vm385_vm6, %v383_v62, -inf  ;;  %v519_v61 = vrot.slane %v1279_v23, %v518_v60 }
 0x355   :  { %387 = vmax.xlane.f32.xlu1 %v386_v1  ;;  %v1048_v3 = vpop.f32.mrf.mxu1 }
 0x357   :  { %v359_v5 = vpop.f32.mrf.mxu1 }
 0x358   :  { %v366_v6 = vmul.f32 0.17677669, %v359_v5 }
 0x359   :  { %v1053_v7 = vpop.f32.mrf.mxu1 }
 0x35a   :  { %v384_v8 = vadd.f32 %v380_v4, %v366_v6 }
 0x35b   :  { %v362_v9 = vpop.f32.mrf.mxu1 }
 0x35c   :  { %v389_v10 = vsel %vm385_vm6, %v384_v8, -inf }
 0x35d   :  { %390 = vmax.xlane.f32.xlu0 %v389_v10  ;;  %v1054_v11 = vpop.f32.mrf.mxu1 }
 0x373   :  { %256 = vrot.lane.b32.xlu0 %v254_v13, %s1155_s1 }
 0x3de   :  { %v388_v14 = vpop.xlane.xlu1 %387 }
 0x3df   :  { %v392_v15 = vsub.f32 %v383_v62, %v388_v14 }
 0x3e1   :  { %v394_v16 = vmul.f32 1.442695, %v392_v15 }
 0x3e3   :  { %1130 = vpow2.f32 %v394_v16 }
 0x3e6   :  { %v391_v17 = vpop.xlane.xlu0 %390 }
 0x3e7   :  { %v393_v18 = vsub.f32 %v384_v8, %v391_v17 }
 0x3e9   :  { %v396_v19 = vmul.f32 1.442695, %v393_v18 }
 0x3ea   :  { %v257_v20 = vpop.permute.xlu0 %256 }
 0x3eb   :  { %1132 = vpow2.f32 %v396_v19  ;;  %v260_v24 = vadd.f32 %v257_v20, %v1299_v39  ;;  %v259_v32 = vadd.f32 %v257_v20, %v1296_v35  ;;  %v1123_v19 = vld [vmem:[%s1459_s7] sm:$0xff]   ;;  %v1124_v20 = vld [vmem:[%s1460_s8 + $0x18] sm:$0xff]  }
 0x3ed   :  { %v411_v25 = vpack.c.bf16 %v260_v24, %v260_v24  ;;  %v410_v33 = vpack.c.bf16 %v259_v32, %v259_v32  ;;  %v607_v32 = vsub.s32 4, %v1272_v21 }
 0x3ef   :  { %463 = vrot.lane.b32.xlu0 %v411_v25, %s1155_s1 }
 0x3f0   :  { %v1131_v26 = vpop.eup %1130 }
 0x3f1   :  { %v398_v27 = vsel %vm385_vm6, %v1131_v26, 0.0 }
 0x3f2   :  { %399 = vadd.xlane.f32.xlu1 %v398_v27 }
 0x3f8   :  { %v1133_v28 = vpop.eup %1132 }
 0x3f9   :  { %v401_v29 = vsel %vm385_vm6, %v1133_v28, 0.0 }
 0x3fa   :  { %402 = vadd.xlane.f32.xlu1 %v401_v29 }
 0x40b   :  { %413 = vrot.lane.b32.xlu1 %v410_v33, %s1155_s1 }
 0x461   :  { %v464_v34 = vpop.permute.xlu0 %463 }
 0x462   :  { %v469_v36 = vsel %vm418_vm7, %v464_v34, 0 }
 0x463   :  { %1062 = vmatpush3.bf16.msra.mxu0 %v469_v36  ;;  %v608_v36 = vrot.slane %v1279_v23, %v607_v32 }
 0x464   :  { %1075 = vmatprep.subr.bf16.mxu0 %v1151_v2 }
 0x47b   :  { %v400_v37 = vpop.xlane.xlu1 %399 }
 0x47c   :  { %1134 = vrcp.f32 %v400_v37  ;;  %v613_v37 = vsub.s32 5, %v1272_v21 }
 0x483   :  { %v403_v38 = vpop.xlane.xlu1 %402 }
 0x484   :  { %1136 = vrcp.f32 %v403_v38 }
 0x487   :  { %v414_v39 = vpop.permute.xlu1 %413 }
 0x488   :  { %v420_v40 = vsel %vm418_vm7, %v414_v39, 0 }
 0x489   :  { %v1135_v41 = vpop.eup %1134  ;;  %1056 = vmatpush3.bf16.msra.mxu1 %v420_v40 }
 0x48a   :  { %v406_v42 = vmul.f32 %v1135_v41, %v1131_v26  ;;  %1067 = vmatprep.subr.bf16.mxu1 %v1151_v2  ;;  %v614_v41 = vrot.slane %v1279_v23, %v613_v37 }
 0x48c   :  { %v408_v35 = vpack.c.bf16 %v406_v42, %v406_v42 }
 0x48e   :  { %1058 = vmatmul.mubr.msk.bf16.vlgmr.msra.gmra.mxu1 %vm385_vm6, %v408_v35 }
 0x48f   :  { %1071 = vmatprep.mubr.msk.bf16.mxu1 %vm1152_vm1, %v1151_v2  ;;  %1068 = vmatpush3.bf16.msra.mxu1 %v1120_v47  ;;  %v1126_v47 = vld [vmem:[%s1460_s8 + $0x8] sm:$0xff]  }
 0x490   :  { %1069 = vmatprep.subr.bf16.mxu1 %v1151_v2 }
 0x491   :  { %v1137_v44 = vpop.eup %1136 }
 0x492   :  { %v407_v45 = vmul.f32 %v1137_v44, %v1133_v28 }
 0x493   :  { %1070 = vmatpush3.bf16.msra.mxu1 %v1121_v48  ;;  %v1127_v48 = vld [vmem:[%s1460_s8] sm:$0xff]  }
 0x494   :  { %v409_v46 = vpack.c.bf16 %v407_v45, %v407_v45  ;;  %1083 = vmatprep.subr.bf16.mxu1 %v1151_v2 }
 0x496   :  { %1064 = vmatmul.mubr.msk.bf16.vlgmr.msra.gmra.mxu0 %vm385_vm6, %v409_v46  ;;  %v1125_v46 = vld [vmem:[%s1460_s8 + $0x10] sm:$0xff]  }
 0x497   :  { %1079 = vmatprep.mubr.msk.bf16.mxu0 %vm1152_vm1, %v1151_v2 }
 0x54e   :  { %v456_v49 = vpop.f32.mrf.mxu1 }
 0x550   :  { %v1059_v50 = vpop.f32.mrf.mxu1 }
 0x552   :  { %v459_v51 = vpop.f32.mrf.mxu1 }
 0x554   :  { %v1060_v52 = vpop.f32.mrf.mxu1 }
 0x556   :  { %v505_v54 = vpop.f32.mrf.mxu0 }
 0x557   :  { %v511_v55 = vpack.c.bf16 %v505_v54, %v456_v49  ;;  %v1405_v49 = vld [vmem:[%s1461_s11] sm:$0xf] }
 0x558   :  { %v1065_v57 = vpop.f32.mrf.mxu0  ;;  %v625_v50 = vrot.slane %v1405_v49, %v1303_v43 }
 0x559   :  { %1072 = vmatmul.mubr.msk.bf16.vlgmr.msra.gmra.mxu1 %vm190_vm5, %v511_v55 }
 0x55a   :  { %v508_v58 = vpop.f32.mrf.mxu0  ;;  %1091 = vmatprep.mubr.msk.bf16.mxu1 %vm1152_vm1, %v1151_v2  ;;  %1084 = vmatpush3.bf16.msra.mxu1 %v1124_v20 }
 0x55b   :  { %1085 = vmatprep.subr.bf16.mxu1 %v1151_v2 }
 0x55c   :  { %v1066_v59 = vpop.f32.mrf.mxu0 }
 0x55e   :  { %1086 = vmatpush3.bf16.msra.mxu1 %v1125_v46 }
 0x55f   :  { %1087 = vmatprep.subr.bf16.mxu1 %v1151_v2 }
 0x562   :  { %1088 = vmatpush3.bf16.msra.mxu1 %v1126_v47 }
 0x563   :  { %1089 = vmatprep.subr.bf16.mxu1 %v1151_v2 }
 0x566   :  { %1090 = vmatpush3.bf16.msra.mxu1 %v1127_v48 }
 0x619   :  { %v569_v62 = vpop.f32.mrf.mxu1 }
 0x61a   :  { %v570_v63 = vadd.f32 %v569_v62, %v519_v61 }
 0x61b   :  { %v1073_v0 = vpop.f32.mrf.mxu1 }
 0x61c   :  { %v576_v1 = vadd.f32 %v570_v63, %v1287_v30  ;;  %v695_v63 = vsub.s32 6, %v1272_v21 }
 0x61d   :  { %v572_v3 = vpop.f32.mrf.mxu1 }
 0x61e   :  { %v573_v4 = vadd.f32 %v572_v3, %v519_v61  ;;  %v578_v5 = vsel %vm190_vm5, %v576_v1, 0.0  ;;  %v696_v0 = vrot.slane %v1279_v23, %v695_v63 }
 0x61f   :  { %579 = vadd.xlane.f32.xlu0 %v578_v5  ;;  %v1074_v6 = vpop.f32.mrf.mxu1 }
 0x620   :  { %v577_v7 = vadd.f32 %v573_v4, %v1289_v31  ;;  %v1122_v31 = vld [vmem:[%s1459_s7 + $0x8] sm:$0xff]  }
 0x621   :  { %1076 = vmatpush3.bf16.msra.mxu0 %v1122_v31 }
 0x622   :  { %v581_v8 = vsel %vm190_vm5, %v577_v7, 0.0  ;;  %1077 = vmatprep.subr.bf16.mxu0 %v1151_v2 }
 0x623   :  { %582 = vadd.xlane.f32.xlu1 %v581_v8 }
 0x625   :  { %1078 = vmatpush3.bf16.msra.mxu0 %v1123_v19 }
 0x626   :  { %1095 = vmatprep.subr.bf16.mxu0 %v1151_v2 }
 0x6a8   :  { %v580_v9 = vpop.xlane.xlu0 %579 }
 0x6a9   :  { %v585_v10 = vmul.f32 0.03125, %v580_v9 }
 0x6ab   :  { %v587_v11 = vsub.f32 %v576_v1, %v585_v10 }
 0x6ac   :  { %v583_v13 = vpop.xlane.xlu1 %582 }
 0x6ad   :  { %v586_v14 = vmul.f32 0.03125, %v583_v13  ;;  %v589_v15 = vmul.f32 %v587_v11, %v587_v11  ;;  %v809_v13 = vsel %vm808_vm9, %v1322_v53, 0.0  ;;  %v806_v53 = vld [vmem:[%s1462_s2] sm:$0xff] }
 0x6af   :  { %v588_v16 = vsub.f32 %v577_v7, %v586_v14  ;;  %v591_v30 = vsel %vm190_vm5, %v589_v15, 0.0  ;;  %v812_v14 = vsel %vm808_vm9, %v1328_v56, 0.0  ;;  %v807_v56 = vld [vmem:[%s1462_s2 + $0x8] sm:$0xff] }
 0x6b0   :  { %592 = vadd.xlane.f32.xlu0 %v591_v30 }
 0x6b1   :  { %v590_v17 = vmul.f32 %v588_v16, %v588_v16 }
 0x6b3   :  { %v594_v18 = vsel %vm190_vm5, %v590_v17, 0.0 }
 0x6b4   :  { %595 = vadd.xlane.f32.xlu0 %v594_v18 }
 0x739   :  { %v593_v24 = vpop.xlane.xlu0 %592 }
 0x73a   :  { %v597_v25 = vmul.f32 0.03125, %v593_v24 }
 0x73c   :  { %v599_v26 = vadd.f32 1e-05, %v597_v25 }
 0x73d   :  { %v596_v27 = vpop.xlane.xlu0 %595 }
 0x73e   :  { %1138 = vrsqrt.f32 %v599_v26  ;;  %v598_v28 = vmul.f32 0.03125, %v596_v27  ;;  %v1128_v26 = vld [vmem:[%s1463_s9 + $0x8] sm:$0xff]   ;;  %v1129_v27 = vld [vmem:[%s1463_s9] sm:$0xff]  }
 0x740   :  { %v600_v29 = vadd.f32 1e-05, %v598_v28 }
 0x742   :  { %1140 = vrsqrt.f32 %v600_v29 }
 0x74b   :  { %v1139_v33 = vpop.eup %1138 }
 0x74c   :  { %v603_v34 = vmul.f32 %v1139_v33, %v587_v11 }
 0x74e   :  { %v609_v40 = vmul.f32 %v608_v36, %v603_v34 }
 0x74f   :  { %v1141_v38 = vpop.eup %1140 }
 0x750   :  { %v604_v39 = vmul.f32 %v1141_v38, %v588_v16  ;;  %v615_v35 = vadd.f32 %v614_v41, %v609_v40 }
 0x752   :  { %v610_v42 = vmul.f32 %v608_v36, %v604_v39  ;;  %v796_v39 = vsub.s32 7, %v1272_v21 }
 0x754   :  { %v616_v44 = vadd.f32 %v614_v41, %v610_v42  ;;  %v797_v40 = vrot.slane %v1279_v23, %v796_v39 }
 0x756   :  { %v617_v45 = vpack.c.bf16 %v616_v44, %v615_v35 }
 0x758   :  { %1080 = vmatmul.mubr.msk.bf16.vlgmr.msra.gmra.mxu0 %vm190_vm5, %v617_v45 }
 0x759   :  { %1099 = vmatprep.mubr.msk.bf16.mxu0 %vm1152_vm1, %v1151_v2  ;;  %1096 = vmatpush3.bf16.msra.mxu0 %v1128_v26 }
 0x75a   :  { %1097 = vmatprep.subr.bf16.mxu0 %v1151_v2 }
 0x75d   :  { %1098 = vmatpush3.bf16.msra.mxu0 %v1129_v27 }
 0x818   :  { %v675_v51 = vpop.f32.mrf.mxu0 }
 0x819   :  { %v676_v54 = vadd.f32 %v675_v51, %v625_v50 }
 0x81a   :  { %v1081_v52 = vpop.f32.mrf.mxu0 }
 0x81b   :  { %v682_v59 = vmax.f32 %v676_v54, 0.0 }
 0x81c   :  { %v678_v55 = vpop.f32.mrf.mxu0 }
 0x81d   :  { %v679_v57 = vadd.f32 %v678_v55, %v625_v50 }
 0x81e   :  { %v1082_v58 = vpop.f32.mrf.mxu0 }
 0x81f   :  { %v683_v61 = vmax.f32 %v679_v57, 0.0 }
 0x821   :  { %v684_v62 = vpack.c.bf16 %v683_v61, %v682_v59 }
 0x823   :  { %1092 = vmatmul.mubr.msk.bf16.vlgmr.msra.gmra.mxu1 %vm721_vm8, %v684_v62 }
 0x8e3   :  { %v759_v1 = vpop.f32.mrf.mxu1 }
 0x8e4   :  { %v760_v3 = vadd.f32 %v759_v1, %v696_v0 }
 0x8e5   :  { %v1093_v4 = vpop.f32.mrf.mxu1 }
 0x8e6   :  { %v766_v5 = vadd.f32 %v760_v3, %v615_v35  ;;  %v979_v35 = vld [vmem:[%s1455_s10 + $0x8] ss:$0 sm:$0xff] }
 0x8e7   :  { %v762_v6 = vpop.f32.mrf.mxu1 }
 0x8e8   :  { %v763_v7 = vadd.f32 %v762_v6, %v696_v0  ;;  %v768_v8 = vsel %vm190_vm5, %v766_v5, 0.0 }
 0x8e9   :  { %769 = vadd.xlane.f32.xlu1 %v768_v8  ;;  %v1094_v9 = vpop.f32.mrf.mxu1 }
 0x8ea   :  { %v767_v10 = vadd.f32 %v763_v7, %v616_v44 }
 0x8ec   :  { %v771_v11 = vsel %vm190_vm5, %v767_v10, 0.0 }
 0x8ed   :  { %772 = vadd.xlane.f32.xlu0 %v771_v11  ;;  %810 = vadd.xlane.f32.xlu1 %v809_v13 }
 0x8f1   :  { %813 = vadd.xlane.f32.xlu0 %v812_v14 }
 0x972   :  { %v770_v15 = vpop.xlane.xlu1 %769 }
 0x973   :  { %v774_v16 = vmul.f32 0.03125, %v770_v15 }
 0x975   :  { %v776_v30 = vsub.f32 %v766_v5, %v774_v16 }
 0x976   :  { %v773_v17 = vpop.xlane.xlu0 %772  ;;  %v811_v28 = vpop.xlane.xlu1 %810 }
 0x977   :  { %v775_v18 = vmul.f32 0.03125, %v773_v17  ;;  %v778_v31 = vmul.f32 %v776_v30, %v776_v30  ;;  %v815_v41 = vmax.f32 %v811_v28, 1.0 }
 0x979   :  { %v777_v19 = vsub.f32 %v767_v10, %v775_v18  ;;  %v780_v20 = vsel %vm190_vm5, %v778_v31, 0.0  ;;  %v846_v46 = vrot.slane %v815_v41, %v1303_v43 }
 0x97a   :  { %781 = vadd.xlane.f32.xlu1 %v780_v20  ;;  %v814_v29 = vpop.xlane.xlu0 %813 }
 0x97b   :  { %v779_v24 = vmul.f32 %v777_v19, %v777_v19  ;;  %v816_v47 = vmax.f32 %v814_v29, 1.0 }
 0x97d   :  { %v783_v25 = vsel %vm190_vm5, %v779_v24, 0.0  ;;  %v850_v23 = vrot.slane %v816_v47, %v1303_v43 }
 0x97e   :  { %784 = vadd.xlane.f32.xlu0 %v783_v25  ;;  %v931_v25 = vrot.slane %v1405_v49, %v253_v12 }
 0x98b   :  { %819 = vperm.xlu1 %1110, %v806_v53  }
 0x994   :  { %824 = vperm.xlu0 %1109, %v807_v56  }
 0xa03   :  { %v782_v32 = vpop.xlane.xlu1 %781 }
 0xa04   :  { %v786_v33 = vmul.f32 0.03125, %v782_v32  ;;  %v940_v32 = vrot.slane %v1405_v49, %v518_v60 }
 0xa06   :  { %v788_v34 = vadd.f32 1e-05, %v786_v33 }
 0xa07   :  { %v785_v36 = vpop.xlane.xlu0 %784  ;;  %v820_v48 = vpop.permute.xlu1 %819 }
 0xa08   :  { %1142 = vrsqrt.f32 %v788_v34  ;;  %v787_v37 = vmul.f32 0.03125, %v785_v36 }
 0xa0a   :  { %v789_v38 = vadd.f32 1e-05, %v787_v37 }
 0xa0c   :  { %1144 = vrsqrt.f32 %v789_v38 }
 0xa0d   :  { %1146 = vrcp.f32 %v846_v46 }
 0xa0e   :  { %1148 = vrcp.f32 %v850_v23 }
 0xa0f   :  { %v825_v58 = vpop.permute.xlu0 %824 }
 0xa15   :  { %v1143_v2 = vpop.eup %1142 }
 0xa16   :  { %v792_v42 = vmul.f32 %v1143_v2, %v776_v30 }
 0xa18   :  { %v798_v44 = vmul.f32 %v797_v40, %v792_v42 }
 0xa19   :  { %v1145_v45 = vpop.eup %1144 }
 0xa1a   :  { %v793_v50 = vmul.f32 %v1145_v45, %v777_v19  ;;  %v804_v51 = vadd.f32 %v979_v35, %v798_v44  ;;  %v1147_v9 = vpop.eup %1146  ;;  %v864_v19 = vrot.slane %v1405_v49, %v243_v22 }
 0xa1b   :  { %v1149_v13 = vpop.eup %1148 }
 0xa1c   :  { %v799_v52 = vmul.f32 %v797_v40, %v793_v50  ;;  %v827_v54 = vmul.f32 %v820_v48, %v804_v51 }
 0xa1e   :  { %v805_v55 = vadd.f32 %v979_v35, %v799_v52  ;;  %v829_v57 = vsel %vm190_vm5, %v827_v54, 0.0 }
 0xa1f   :  { %v830_v59 = vrot.slane %v829_v57, 4 }
 0xa20   :  { %v828_v61 = vmul.f32 %v825_v58, %v805_v55 }
 0xa21   :  { %v831_v62 = vadd.f32 %v830_v59, %v829_v57 }
 0xa22   :  { %v836_v63 = vsel %vm190_vm5, %v828_v61, 0.0 }
 0xa23   :  { %v837_v0 = vrot.slane %v836_v63, 4  ;;  %v832_v1 = vrot.slane %v831_v62, 2 }
 0xa25   :  { %v838_v3 = vadd.f32 %v837_v0, %v836_v63  ;;  %v833_v4 = vadd.f32 %v832_v1, %v831_v62 }
 0xa27   :  { %v839_v5 = vrot.slane %v838_v3, 2  ;;  %v834_v6 = vrot.slane %v833_v4, 1 }
 0xa29   :  { %v840_v7 = vadd.f32 %v839_v5, %v838_v3  ;;  %v835_v8 = vadd.f32 %v834_v6, %v833_v4 }
 0xa2b   :  { %v841_v43 = vrot.slane %v840_v7, 1  ;;  %v852_v10 = vmul.f32 %v1147_v9, %v835_v8 }
 0xa2d   :  { %v842_v11 = vadd.f32 %v841_v43, %v840_v7  ;;  %v855_v15 = vpack.c.bf16 %v852_v10, %v852_v10 }
 0xa2f   :  { %v854_v14 = vmul.f32 %v1149_v13, %v842_v11  ;;  %v867_v17 = vunpack.c.l.b16 %v855_v15 }
 0xa31   :  { %v856_v16 = vpack.c.bf16 %v854_v14, %v854_v14 }
 0xa33   :  { %v868_v30 = vunpack.c.l.b16 %v856_v16 }
 0xa35   :  { %v870_v18 = vsel %vm869_vm10, %v868_v30, %v867_v17 }
 0xa36   :  { %v871_v31 = vpack.c.b16 %v870_v18, %v870_v18 }
 0xa38   :  { %1100 = vmatmul.mubr.msk.bf16.vlgmr.msra.gmra.mxu0 %vm190_vm5, %v871_v31 }
 0xaf8   :  { %v921_v20 = vpop.f32.mrf.mxu0 }
 0xaf9   :  { %v922_v24 = vadd.f32 %v921_v20, %v864_v19 }
 0xafa   :  { %v1101_v53 = vpop.f32.mrf.mxu0 }
 0xafb   :  { %v927_v56 = vmax.f32 %v922_v24, 0.0 }
 0xafc   :  { %v924_v26 = vpop.f32.mrf.mxu0 }
 0xafd   :  { %v932_v27 = vmul.f32 %v931_v25, %v927_v56 }
 0xafe   :  { %v1102_v28 = vpop.f32.mrf.mxu0 }
 0xaff   :  { %v934_v29 = vsel %vm933_vm11, %v932_v27, 0.0 }
 0xb00   :  { %935 = vadd.xlane.f32.xlu1 %v934_v29 }
 0xb89   :  { %v936_v22 = vpop.xlane.xlu1 %935 }
 0xb8a   :  { %v941_v33 = vadd.f32 %v940_v32, %v936_v22 }
 0xb8c   :  { %943 = vst.msk [vmem:[%s1464_s12] sm:$0x3] %vm942_vm12, %v941_v33 }

// kernel: tpu_custom_call.1
= control target key start
LH: loop header
LB: loop body
LE: loop exit
PB: predicated region body
PF: predicated region fallthrough
CT: control target
= control target key end

     0   :  { %v1150_v0 = vmov 0   ;;  %v1151_v2 = vmov 0.0   ;;  %vm124_vm0 = vcmask 1041408   ;;  %vm1152_vm1 = vmmov 0   ;;  %s1153_s25 = smov 32   ;;  %s1452_s0 = inlined_call_operand.vmem [shape: s32[2,8,1], index: 0, kind: input, shape index: {}]   ;;  %s1453_s3 = inlined_call_operand.vmem [shape: bf16[100,32], index: 3, kind: input, shape index: {}]   ;;  %s1454_s5 = inlined_call_operand.vmem [shape: bf16[32,96], index: 5, kind: input, shape index: {}]   ;;  %s1455_s10 = inlined_call_operand.vmem [shape: f32[9,32], index: 10, kind: input, shape index: {}]   ;;  %s1456_s4 = inlined_call_operand.vmem [shape: bf16[8,32], index: 4, kind: input, shape index: {}]   ;;  %s1457_s1 = inlined_call_operand.vmem [shape: f32[2,1,8], index: 1, kind: input, shape index: {}]   ;;  %s1458_s6 = inlined_call_operand.vmem [shape: bf16[32,32], index: 6, kind: input, shape index: {}]   ;;  %s1459_s7 = inlined_call_operand.vmem [shape: bf16[32,64], index: 7, kind: input, shape index: {}]   ;;  %s1460_s8 = inlined_call_operand.vmem [shape: bf16[64,32], index: 8, kind: input, shape index: {}]   ;;  %s1461_s11 = inlined_call_operand.vmem [shape: f32[4,64], index: 11, kind: input, shape index: {}]   ;;  %s1462_s2 = inlined_call_operand.vmem [shape: f32[2,8,1], index: 2, kind: input, shape index: {}]   ;;  %s1463_s9 = inlined_call_operand.vmem [shape: bf16[32,64], index: 9, kind: input, shape index: {}]   ;;  %s1464_s12 = inlined_call_operand.vmem [shape: f32[2,1], index: 12, kind: output, shape index: {}]  }
   0x1   :  { %1109 = vset.pattern.permute.xlu0 %v1150_v0  ;;  %v45_v1 = vld [vmem:[%s1452_s0] sm:$0xff]  ;;  %1017 = vmatprep.subr.bf16.mxu0 %v1151_v2  ;;  %v46_v3 = vld [vmem:[%s1452_s0 + $0x8] sm:$0xff]  ;;  %v1111_v4 = vld [vmem:[%s1453_s3 + $0x30] ss:$0 sps:$4 sm:$0x33]   ;;  %v47_v12 = vlaneseq  ;;  %vm120_vm4 = vcmask 818176  }
   0x2   :  { %50 = vperm.xlu0 %1109, %v45_v1   ;;  %1035 = vmatprep.subr.bf16.mxu1 %v1151_v2  ;;  %v126_v5 = vsel %vm124_vm0, %v1111_v4, 0  ;;  %v1112_v6 = vld [vmem:[%s1453_s3 + $0x28] sm:$0xff]   ;;  %v1113_v7 = vld [vmem:[%s1453_s3 + $0x20] sm:$0xff]   ;;  %v1114_v8 = vld [vmem:[%s1453_s3 + $0x18] sm:$0xff]   ;;  %vm190_vm5 = vcmask 261120   ;;  %vm385_vm6 = vcmask 64512  }
   0x3   :  { %1110 = vset.pattern.permute.xlu1 %v1150_v0  ;;  %1018 = vmatpush3.bf16.msra.mxu0 %v126_v5  ;;  %v1115_v9 = vld [vmem:[%s1453_s3 + $0x10] sm:$0xff]   ;;  %v1116_v10 = vld [vmem:[%s1453_s3 + $0x8] sm:$0xff]   ;;  %v1117_v11 = vld [vmem:[%s1453_s3] sm:$0xff]   ;;  %v48_v13 = vand.u32 127, %v47_v12  ;;  %v1272_v21 = vshrl.u32 %v47_v12, 7  ;;  %vm418_vm7 = vcmask 1043456  }
   0x4   :  { %1019 = vmatprep.subr.bf16.mxu0 %v1151_v2  ;;  %1031 = vmatprep.mubr.msk.bf16.mxu0 %vm1152_vm1, %v1151_v2  ;;  %v1118_v19 = vld [vmem:[%s1454_s5 + $0x8] sm:$0xff]   ;;  %v1119_v20 = vld [vmem:[%s1454_s5] sm:$0xff]   ;;  %vm721_vm8 = vcmask 523264   ;;  %vm808_vm9 = vcmask 57344   ;;  %vm869_vm10 = vcmask 1041409   ;;  %vm933_vm11 = vcmask 517120  }
   0x5   :  { %1039 = vmatprep.mubr.msk.bf16.mxu1 %vm1152_vm1, %v1151_v2  ;;  %1036 = vmatpush3.bf16.msra.mxu1 %v1118_v19  ;;  %v243_v22 = vsub.s32 1, %v1272_v21  ;;  %v1279_v23 = vld [vmem:[%s1455_s10] sm:$0xff]  ;;  %v1303_v43 = vsub.s32 0, %v1272_v21  ;;  %v253_v12 = vsub.s32 2, %v1272_v21  ;;  %vm942_vm12 = vcmask 1024  }
   0x6   :  { %53 = vperm.xlu0 %1109, %v46_v3   ;;  %1037 = vmatprep.subr.bf16.mxu1 %v1151_v2  ;;  %v169_v25 = vld [vmem:[%s1456_s4] sm:$0xf]  ;;  %s1154_s4 = smov 96  }
   0x7   :  { %1020 = vmatpush3.bf16.msra.mxu0 %v1112_v6  ;;  %v244_v24 = vrot.slane %v1279_v23, %v243_v22  ;;  %v170_v27 = vunpack.c.l.bf16 %v169_v25  ;;  %v238_v44 = vrot.slane %v1279_v23, %v1303_v43  ;;  %v1322_v53 = vld [vmem:[%s1457_s1] sm:$0x1]  ;;  %v1328_v56 = vld [vmem:[%s1457_s1 + $0x1] sm:$0x1]  ;;  %s1155_s1 = smov 64  }
   0x8   :  { %1021 = vmatprep.subr.bf16.mxu0 %v1151_v2  ;;  %v964_v54 = vadd.f32 -1.0, %v1322_v53  ;;  %v965_v58 = vadd.f32 -1.0, %v1328_v56 }
   0x9   :  { %1038 = vmatpush3.bf16.msra.mxu1 %v1119_v20  ;;  %246 = vrot.lane.b32.xlu1 %v244_v24, %s1153_s25 }
   0xa   :  { %1043 = vmatprep.subr.bf16.mxu1 %v1151_v2  ;;  %v369_v55 = vmul.f32 1e+09, %v964_v54  ;;  %v370_v63 = vmul.f32 1e+09, %v965_v58 }
   0xb   :  { %1022 = vmatpush3.bf16.msra.mxu0 %v1113_v7 }
   0xc   :  { %1023 = vmatprep.subr.bf16.mxu0 %v1151_v2  ;;  %v376_v57 = vrot.slane %v369_v55, %v1303_v43  ;;  %v380_v4 = vrot.slane %v370_v63, %v1303_v43 }
   0xf   :  { %1024 = vmatpush3.bf16.msra.mxu0 %v1114_v8 }
  0x10   :  { %1025 = vmatprep.subr.bf16.mxu0 %v1151_v2 }
  0x13   :  { %1026 = vmatpush3.bf16.msra.mxu0 %v1115_v9 }
  0x14   :  { %1027 = vmatprep.subr.bf16.mxu0 %v1151_v2 }
  0x17   :  { %1028 = vmatpush3.bf16.msra.mxu0 %v1116_v10 }
  0x18   :  { %1029 = vmatprep.subr.bf16.mxu0 %v1151_v2 }
  0x1b   :  { %1030 = vmatpush3.bf16.msra.mxu0 %v1117_v11 }
  0x1c   :  { %1061 = vmatprep.subr.bf16.mxu0 %v1151_v2 }
  0x7b   :  { %v247_v34 = vpop.permute.xlu1 %246 }
  0x7d   :  { %v51_v14 = vpop.permute.xlu0 %50 }
  0x7e   :  { %vm55_vm2 = vcmp.eq.s32.totalorder %v48_v13, %v51_v14 }
  0x7f   :  { %v948_v16 = vsel %vm55_vm2, 1.0, %v1151_v2 }
  0x81   :  { %v54_v15 = vpop.permute.xlu0 %53 }
  0x82   :  { %vm56_vm3 = vcmp.eq.s32.totalorder %v48_v13, %v54_v15  ;;  %v254_v13 = vrot.slane %v1279_v23, %v253_v12 }
  0x83   :  { %v949_v17 = vsel %vm56_vm3, 1.0, %v1151_v2 }
  0x84   :  { %v983_v18 = vpack.c.bf16 %v949_v17, %v948_v16 }
  0x86   :  { %1032 = vmatmul.mubr.msk.bf16.vlgmr.msra.gmra.mxu0 %vm120_vm4, %v983_v18 }
  0x87   :  { %1063 = vmatprep.mubr.msk.bf16.mxu0 %vm1152_vm1, %v1151_v2 }
 0x146   :  { %v162_v26 = vpop.f32.mrf.mxu0 }
 0x147   :  { %v1287_v30 = vadd.f32 %v170_v27, %v162_v26 }
 0x148   :  { %v1033_v28 = vpop.f32.mrf.mxu0 }
 0x14a   :  { %v165_v29 = vpop.f32.mrf.mxu0 }
 0x14b   :  { %v1289_v31 = vadd.f32 %v170_v27, %v165_v29 }
 0x14c   :  { %v1034_v32 = vpop.f32.mrf.mxu0 }
 0x14d   :  { %v173_v33 = vpack.c.bf16 %v1289_v31, %v1287_v30 }
 0x14f   :  { %1040 = vmatmul.mubr.msk.bf16.vlgmr.msra.gmra.mxu1 %vm190_vm5, %v173_v33 }
 0x150   :  { %1045 = vmatprep.mubr.msk.bf16.mxu1 %vm1152_vm1, %v1151_v2 }
 0x20f   :  { %v1296_v35 = vpop.f32.mrf.mxu1 }
 0x210   :  { %v249_v36 = vadd.f32 %v247_v34, %v1296_v35  ;;  %v239_v47 = vadd.f32 %v238_v44, %v1296_v35 }
 0x211   :  { %v1041_v37 = vpop.f32.mrf.mxu1 }
 0x212   :  { %v265_v38 = vpack.c.bf16 %v249_v36, %v249_v36  ;;  %v263_v49 = vpack.c.bf16 %v239_v47, %v239_v47  ;;  %v1120_v47 = vld [vmem:[%s1458_s6 + $0x8] sm:$0xff]  }
 0x213   :  { %v1299_v39 = vpop.f32.mrf.mxu1 }
 0x214   :  { %v250_v40 = vadd.f32 %v247_v34, %v1299_v39  ;;  %268 = vrot.lane.b32.xlu1 %v265_v38, %s1154_s4  ;;  %v240_v51 = vadd.f32 %v238_v44, %v1299_v39 }
 0x215   :  { %v1042_v41 = vpop.f32.mrf.mxu1 }
 0x216   :  { %v266_v42 = vpack.c.bf16 %v250_v40, %v250_v40  ;;  %v264_v52 = vpack.c.bf16 %v240_v51, %v240_v51 }
 0x218   :  { %317 = vrot.lane.b32.xlu0 %v266_v42, %s1154_s4 }
 0x286   :  { %v269_v45 = vpop.permute.xlu1 %268 }
 0x287   :  { %v274_v46 = vsel %vm190_vm5, %v269_v45, 0 }
 0x288   :  { %1044 = vmatpush3.bf16.xpose.msra.mxu1 %v274_v46 }
 0x289   :  { %1049 = vmatprep.subr.bf16.mxu1 %v1151_v2 }
 0x28a   :  { %v318_v48 = vpop.permute.xlu0 %317 }
 0x28b   :  { %v323_v50 = vsel %vm190_vm5, %v318_v48, 0  ;;  %v1121_v48 = vld [vmem:[%s1458_s6] sm:$0xff]  }
 0x28f   :  { %1046 = vmatmul.mubr.msk.bf16.vlgmr.msra.gmra.mxu1 %vm190_vm5, %v263_v49 }
 0x290   :  { %1050 = vmatpush3.bf16.xpose.msra.mxu1 %v323_v50  ;;  %1051 = vmatprep.mubr.msk.bf16.mxu1 %vm1152_vm1, %v1151_v2 }
 0x291   :  { %1055 = vmatprep.subr.bf16.mxu1 %v1151_v2 }
 0x297   :  { %1052 = vmatmul.mubr.msk.bf16.vlgmr.msra.gmra.mxu1 %vm190_vm5, %v264_v52 }
 0x298   :  { %1057 = vmatprep.mubr.msk.bf16.mxu1 %vm1152_vm1, %v1151_v2 }
 0x34f   :  { %v310_v59 = vpop.f32.mrf.mxu1 }
 0x350   :  { %v365_v60 = vmul.f32 0.17677669, %v310_v59 }
 0x351   :  { %v1047_v61 = vpop.f32.mrf.mxu1 }
 0x352   :  { %v383_v62 = vadd.f32 %v376_v57, %v365_v60  ;;  %v518_v60 = vsub.s32 3, %v1272_v21 }
 0x353   :  { %v313_v0 = vpop.f32.mrf.mxu1 }
 0x354   :  { %v386_v1 = vsel %vm385_vm6, %v383_v62, -inf  ;;  %v519_v61 = vrot.slane %v1279_v23, %v518_v60 }
 0x355   :  { %387 = vmax.xlane.f32.xlu1 %v386_v1  ;;  %v1048_v3 = vpop.f32.mrf.mxu1 }
 0x357   :  { %v359_v5 = vpop.f32.mrf.mxu1 }
 0x358   :  { %v366_v6 = vmul.f32 0.17677669, %v359_v5 }
 0x359   :  { %v1053_v7 = vpop.f32.mrf.mxu1 }
 0x35a   :  { %v384_v8 = vadd.f32 %v380_v4, %v366_v6 }
 0x35b   :  { %v362_v9 = vpop.f32.mrf.mxu1 }
 0x35c   :  { %v389_v10 = vsel %vm385_vm6, %v384_v8, -inf }
 0x35d   :  { %390 = vmax.xlane.f32.xlu0 %v389_v10  ;;  %v1054_v11 = vpop.f32.mrf.mxu1 }
 0x373   :  { %256 = vrot.lane.b32.xlu0 %v254_v13, %s1155_s1 }
 0x3de   :  { %v388_v14 = vpop.xlane.xlu1 %387 }
 0x3df   :  { %v392_v15 = vsub.f32 %v383_v62, %v388_v14 }
 0x3e1   :  { %v394_v16 = vmul.f32 1.442695, %v392_v15 }
 0x3e3   :  { %1130 = vpow2.f32 %v394_v16 }
 0x3e6   :  { %v391_v17 = vpop.xlane.xlu0 %390 }
 0x3e7   :  { %v393_v18 = vsub.f32 %v384_v8, %v391_v17 }
 0x3e9   :  { %v396_v19 = vmul.f32 1.442695, %v393_v18 }
 0x3ea   :  { %v257_v20 = vpop.permute.xlu0 %256 }
 0x3eb   :  { %1132 = vpow2.f32 %v396_v19  ;;  %v260_v24 = vadd.f32 %v257_v20, %v1299_v39  ;;  %v259_v32 = vadd.f32 %v257_v20, %v1296_v35  ;;  %v1123_v19 = vld [vmem:[%s1459_s7] sm:$0xff]   ;;  %v1124_v20 = vld [vmem:[%s1460_s8 + $0x18] sm:$0xff]  }
 0x3ed   :  { %v411_v25 = vpack.c.bf16 %v260_v24, %v260_v24  ;;  %v410_v33 = vpack.c.bf16 %v259_v32, %v259_v32  ;;  %v607_v32 = vsub.s32 4, %v1272_v21 }
 0x3ef   :  { %463 = vrot.lane.b32.xlu0 %v411_v25, %s1155_s1 }
 0x3f0   :  { %v1131_v26 = vpop.eup %1130 }
 0x3f1   :  { %v398_v27 = vsel %vm385_vm6, %v1131_v26, 0.0 }
 0x3f2   :  { %399 = vadd.xlane.f32.xlu1 %v398_v27 }
 0x3f8   :  { %v1133_v28 = vpop.eup %1132 }
 0x3f9   :  { %v401_v29 = vsel %vm385_vm6, %v1133_v28, 0.0 }
 0x3fa   :  { %402 = vadd.xlane.f32.xlu1 %v401_v29 }
 0x40b   :  { %413 = vrot.lane.b32.xlu1 %v410_v33, %s1155_s1 }
 0x461   :  { %v464_v34 = vpop.permute.xlu0 %463 }
 0x462   :  { %v469_v36 = vsel %vm418_vm7, %v464_v34, 0 }
 0x463   :  { %1062 = vmatpush3.bf16.msra.mxu0 %v469_v36  ;;  %v608_v36 = vrot.slane %v1279_v23, %v607_v32 }
 0x464   :  { %1075 = vmatprep.subr.bf16.mxu0 %v1151_v2 }
 0x47b   :  { %v400_v37 = vpop.xlane.xlu1 %399 }
 0x47c   :  { %1134 = vrcp.f32 %v400_v37  ;;  %v613_v37 = vsub.s32 5, %v1272_v21 }
 0x483   :  { %v403_v38 = vpop.xlane.xlu1 %402 }
 0x484   :  { %1136 = vrcp.f32 %v403_v38 }
 0x487   :  { %v414_v39 = vpop.permute.xlu1 %413 }
 0x488   :  { %v420_v40 = vsel %vm418_vm7, %v414_v39, 0 }
 0x489   :  { %v1135_v41 = vpop.eup %1134  ;;  %1056 = vmatpush3.bf16.msra.mxu1 %v420_v40 }
 0x48a   :  { %v406_v42 = vmul.f32 %v1135_v41, %v1131_v26  ;;  %1067 = vmatprep.subr.bf16.mxu1 %v1151_v2  ;;  %v614_v41 = vrot.slane %v1279_v23, %v613_v37 }
 0x48c   :  { %v408_v35 = vpack.c.bf16 %v406_v42, %v406_v42 }
 0x48e   :  { %1058 = vmatmul.mubr.msk.bf16.vlgmr.msra.gmra.mxu1 %vm385_vm6, %v408_v35 }
 0x48f   :  { %1071 = vmatprep.mubr.msk.bf16.mxu1 %vm1152_vm1, %v1151_v2  ;;  %1068 = vmatpush3.bf16.msra.mxu1 %v1120_v47  ;;  %v1126_v47 = vld [vmem:[%s1460_s8 + $0x8] sm:$0xff]  }
 0x490   :  { %1069 = vmatprep.subr.bf16.mxu1 %v1151_v2 }
 0x491   :  { %v1137_v44 = vpop.eup %1136 }
 0x492   :  { %v407_v45 = vmul.f32 %v1137_v44, %v1133_v28 }
 0x493   :  { %1070 = vmatpush3.bf16.msra.mxu1 %v1121_v48  ;;  %v1127_v48 = vld [vmem:[%s1460_s8] sm:$0xff]  }
 0x494   :  { %v409_v46 = vpack.c.bf16 %v407_v45, %v407_v45  ;;  %1083 = vmatprep.subr.bf16.mxu1 %v1151_v2 }
 0x496   :  { %1064 = vmatmul.mubr.msk.bf16.vlgmr.msra.gmra.mxu0 %vm385_vm6, %v409_v46  ;;  %v1125_v46 = vld [vmem:[%s1460_s8 + $0x10] sm:$0xff]  }
 0x497   :  { %1079 = vmatprep.mubr.msk.bf16.mxu0 %vm1152_vm1, %v1151_v2 }
 0x54e   :  { %v456_v49 = vpop.f32.mrf.mxu1 }
 0x550   :  { %v1059_v50 = vpop.f32.mrf.mxu1 }
 0x552   :  { %v459_v51 = vpop.f32.mrf.mxu1 }
 0x554   :  { %v1060_v52 = vpop.f32.mrf.mxu1 }
 0x556   :  { %v505_v54 = vpop.f32.mrf.mxu0 }
 0x557   :  { %v511_v55 = vpack.c.bf16 %v505_v54, %v456_v49  ;;  %v1405_v49 = vld [vmem:[%s1461_s11] sm:$0xf] }
 0x558   :  { %v1065_v57 = vpop.f32.mrf.mxu0  ;;  %v625_v50 = vrot.slane %v1405_v49, %v1303_v43 }
 0x559   :  { %1072 = vmatmul.mubr.msk.bf16.vlgmr.msra.gmra.mxu1 %vm190_vm5, %v511_v55 }
 0x55a   :  { %v508_v58 = vpop.f32.mrf.mxu0  ;;  %1091 = vmatprep.mubr.msk.bf16.mxu1 %vm1152_vm1, %v1151_v2  ;;  %1084 = vmatpush3.bf16.msra.mxu1 %v1124_v20 }
 0x55b   :  { %1085 = vmatprep.subr.bf16.mxu1 %v1151_v2 }
 0x55c   :  { %v1066_v59 = vpop.f32.mrf.mxu0 }
 0x55e   :  { %1086 = vmatpush3.bf16.msra.mxu1 %v1125_v46 }
 0x55f   :  { %1087 = vmatprep.subr.bf16.mxu1 %v1151_v2 }
 0x562   :  { %1088 = vmatpush3.bf16.msra.mxu1 %v1126_v47 }
 0x563   :  { %1089 = vmatprep.subr.bf16.mxu1 %v1151_v2 }
 0x566   :  { %1090 = vmatpush3.bf16.msra.mxu1 %v1127_v48 }
 0x619   :  { %v569_v62 = vpop.f32.mrf.mxu1 }
 0x61a   :  { %v570_v63 = vadd.f32 %v569_v62, %v519_v61 }
 0x61b   :  { %v1073_v0 = vpop.f32.mrf.mxu1 }
 0x61c   :  { %v576_v1 = vadd.f32 %v570_v63, %v1287_v30  ;;  %v695_v63 = vsub.s32 6, %v1272_v21 }
 0x61d   :  { %v572_v3 = vpop.f32.mrf.mxu1 }
 0x61e   :  { %v573_v4 = vadd.f32 %v572_v3, %v519_v61  ;;  %v578_v5 = vsel %vm190_vm5, %v576_v1, 0.0  ;;  %v696_v0 = vrot.slane %v1279_v23, %v695_v63 }
 0x61f   :  { %579 = vadd.xlane.f32.xlu0 %v578_v5  ;;  %v1074_v6 = vpop.f32.mrf.mxu1 }
 0x620   :  { %v577_v7 = vadd.f32 %v573_v4, %v1289_v31  ;;  %v1122_v31 = vld [vmem:[%s1459_s7 + $0x8] sm:$0xff]  }
 0x621   :  { %1076 = vmatpush3.bf16.msra.mxu0 %v1122_v31 }
 0x622   :  { %v581_v8 = vsel %vm190_vm5, %v577_v7, 0.0  ;;  %1077 = vmatprep.subr.bf16.mxu0 %v1151_v2 }
 0x623   :  { %582 = vadd.xlane.f32.xlu1 %v581_v8 }
 0x625   :  { %1078 = vmatpush3.bf16.msra.mxu0 %v1123_v19 }
 0x626   :  { %1095 = vmatprep.subr.bf16.mxu0 %v1151_v2 }
 0x6a8   :  { %v580_v9 = vpop.xlane.xlu0 %579 }
 0x6a9   :  { %v585_v10 = vmul.f32 0.03125, %v580_v9 }
 0x6ab   :  { %v587_v11 = vsub.f32 %v576_v1, %v585_v10 }
 0x6ac   :  { %v583_v13 = vpop.xlane.xlu1 %582 }
 0x6ad   :  { %v586_v14 = vmul.f32 0.03125, %v583_v13  ;;  %v589_v15 = vmul.f32 %v587_v11, %v587_v11  ;;  %v809_v13 = vsel %vm808_vm9, %v1322_v53, 0.0  ;;  %v806_v53 = vld [vmem:[%s1462_s2] sm:$0xff] }
 0x6af   :  { %v588_v16 = vsub.f32 %v577_v7, %v586_v14  ;;  %v591_v30 = vsel %vm190_vm5, %v589_v15, 0.0  ;;  %v812_v14 = vsel %vm808_vm9, %v1328_v56, 0.0  ;;  %v807_v56 = vld [vmem:[%s1462_s2 + $0x8] sm:$0xff] }
 0x6b0   :  { %592 = vadd.xlane.f32.xlu0 %v591_v30 }
 0x6b1   :  { %v590_v17 = vmul.f32 %v588_v16, %v588_v16 }
 0x6b3   :  { %v594_v18 = vsel %vm190_vm5, %v590_v17, 0.0 }
 0x6b4   :  { %595 = vadd.xlane.f32.xlu0 %v594_v18 }
 0x739   :  { %v593_v24 = vpop.xlane.xlu0 %592 }
 0x73a   :  { %v597_v25 = vmul.f32 0.03125, %v593_v24 }
 0x73c   :  { %v599_v26 = vadd.f32 1e-05, %v597_v25 }
 0x73d   :  { %v596_v27 = vpop.xlane.xlu0 %595 }
 0x73e   :  { %1138 = vrsqrt.f32 %v599_v26  ;;  %v598_v28 = vmul.f32 0.03125, %v596_v27  ;;  %v1128_v26 = vld [vmem:[%s1463_s9 + $0x8] sm:$0xff]   ;;  %v1129_v27 = vld [vmem:[%s1463_s9] sm:$0xff]  }
 0x740   :  { %v600_v29 = vadd.f32 1e-05, %v598_v28 }
 0x742   :  { %1140 = vrsqrt.f32 %v600_v29 }
 0x74b   :  { %v1139_v33 = vpop.eup %1138 }
 0x74c   :  { %v603_v34 = vmul.f32 %v1139_v33, %v587_v11 }
 0x74e   :  { %v609_v40 = vmul.f32 %v608_v36, %v603_v34 }
 0x74f   :  { %v1141_v38 = vpop.eup %1140 }
 0x750   :  { %v604_v39 = vmul.f32 %v1141_v38, %v588_v16  ;;  %v615_v35 = vadd.f32 %v614_v41, %v609_v40 }
 0x752   :  { %v610_v42 = vmul.f32 %v608_v36, %v604_v39  ;;  %v796_v39 = vsub.s32 7, %v1272_v21 }
 0x754   :  { %v616_v44 = vadd.f32 %v614_v41, %v610_v42  ;;  %v797_v40 = vrot.slane %v1279_v23, %v796_v39 }
 0x756   :  { %v617_v45 = vpack.c.bf16 %v616_v44, %v615_v35 }
 0x758   :  { %1080 = vmatmul.mubr.msk.bf16.vlgmr.msra.gmra.mxu0 %vm190_vm5, %v617_v45 }
 0x759   :  { %1099 = vmatprep.mubr.msk.bf16.mxu0 %vm1152_vm1, %v1151_v2  ;;  %1096 = vmatpush3.bf16.msra.mxu0 %v1128_v26 }
 0x75a   :  { %1097 = vmatprep.subr.bf16.mxu0 %v1151_v2 }
 0x75d   :  { %1098 = vmatpush3.bf16.msra.mxu0 %v1129_v27 }
 0x818   :  { %v675_v51 = vpop.f32.mrf.mxu0 }
 0x819   :  { %v676_v54 = vadd.f32 %v675_v51, %v625_v50 }
 0x81a   :  { %v1081_v52 = vpop.f32.mrf.mxu0 }
 0x81b   :  { %v682_v59 = vmax.f32 %v676_v54, 0.0 }
 0x81c   :  { %v678_v55 = vpop.f32.mrf.mxu0 }
 0x81d   :  { %v679_v57 = vadd.f32 %v678_v55, %v625_v50 }
 0x81e   :  { %v1082_v58 = vpop.f32.mrf.mxu0 }
 0x81f   :  { %v683_v61 = vmax.f32 %v679_v57, 0.0 }
 0x821   :  { %v684_v62 = vpack.c.bf16 %v683_v61, %v682_v59 }
 0x823   :  { %1092 = vmatmul.mubr.msk.bf16.vlgmr.msra.gmra.mxu1 %vm721_vm8, %v684_v62 }
 0x8e3   :  { %v759_v1 = vpop.f32.mrf.mxu1 }
 0x8e4   :  { %v760_v3 = vadd.f32 %v759_v1, %v696_v0 }
 0x8e5   :  { %v1093_v4 = vpop.f32.mrf.mxu1 }
 0x8e6   :  { %v766_v5 = vadd.f32 %v760_v3, %v615_v35  ;;  %v979_v35 = vld [vmem:[%s1455_s10 + $0x8] ss:$0 sm:$0xff] }
 0x8e7   :  { %v762_v6 = vpop.f32.mrf.mxu1 }
 0x8e8   :  { %v763_v7 = vadd.f32 %v762_v6, %v696_v0  ;;  %v768_v8 = vsel %vm190_vm5, %v766_v5, 0.0 }
 0x8e9   :  { %769 = vadd.xlane.f32.xlu1 %v768_v8  ;;  %v1094_v9 = vpop.f32.mrf.mxu1 }
 0x8ea   :  { %v767_v10 = vadd.f32 %v763_v7, %v616_v44 }
 0x8ec   :  { %v771_v11 = vsel %vm190_vm5, %v767_v10, 0.0 }
 0x8ed   :  { %772 = vadd.xlane.f32.xlu0 %v771_v11  ;;  %810 = vadd.xlane.f32.xlu1 %v809_v13 }
 0x8f1   :  { %813 = vadd.xlane.f32.xlu0 %v812_v14 }
 0x972   :  { %v770_v15 = vpop.xlane.xlu1 %769 }
 0x973   :  { %v774_v16 = vmul.f32 0.03125, %v770_v15 }
 0x975   :  { %v776_v30 = vsub.f32 %v766_v5, %v774_v16 }
 0x976   :  { %v773_v17 = vpop.xlane.xlu0 %772  ;;  %v811_v28 = vpop.xlane.xlu1 %810 }
 0x977   :  { %v775_v18 = vmul.f32 0.03125, %v773_v17  ;;  %v778_v31 = vmul.f32 %v776_v30, %v776_v30  ;;  %v815_v41 = vmax.f32 %v811_v28, 1.0 }
 0x979   :  { %v777_v19 = vsub.f32 %v767_v10, %v775_v18  ;;  %v780_v20 = vsel %vm190_vm5, %v778_v31, 0.0  ;;  %v846_v46 = vrot.slane %v815_v41, %v1303_v43 }
 0x97a   :  { %781 = vadd.xlane.f32.xlu1 %v780_v20  ;;  %v814_v29 = vpop.xlane.xlu0 %813 }
 0x97b   :  { %v779_v24 = vmul.f32 %v777_v19, %v777_v19  ;;  %v816_v47 = vmax.f32 %v814_v29, 1.0 }
 0x97d   :  { %v783_v25 = vsel %vm190_vm5, %v779_v24, 0.0  ;;  %v850_v23 = vrot.slane %v816_v47, %v1303_v43 }
 0x97e   :  { %784 = vadd.xlane.f32.xlu0 %v783_v25  ;;  %v931_v25 = vrot.slane %v1405_v49, %v253_v12 }
 0x98b   :  { %819 = vperm.xlu1 %1110, %v806_v53  }
 0x994   :  { %824 = vperm.xlu0 %1109, %v807_v56  }
 0xa03   :  { %v782_v32 = vpop.xlane.xlu1 %781 }
 0xa04   :  { %v786_v33 = vmul.f32 0.03125, %v782_v32  ;;  %v940_v32 = vrot.slane %v1405_v49, %v518_v60 }
 0xa06   :  { %v788_v34 = vadd.f32 1e-05, %v786_v33 }
 0xa07   :  { %v785_v36 = vpop.xlane.xlu0 %784  ;;  %v820_v48 = vpop.permute.xlu1 %819 }
 0xa08   :  { %1142 = vrsqrt.f32 %v788_v34  ;;  %v787_v37 = vmul.f32 0.03125, %v785_v36 }
 0xa0a   :  { %v789_v38 = vadd.f32 1e-05, %v787_v37 }
 0xa0c   :  { %1144 = vrsqrt.f32 %v789_v38 }
 0xa0d   :  { %1146 = vrcp.f32 %v846_v46 }
 0xa0e   :  { %1148 = vrcp.f32 %v850_v23 }
 0xa0f   :  { %v825_v58 = vpop.permute.xlu0 %824 }
 0xa15   :  { %v1143_v2 = vpop.eup %1142 }
 0xa16   :  { %v792_v42 = vmul.f32 %v1143_v2, %v776_v30 }
 0xa18   :  { %v798_v44 = vmul.f32 %v797_v40, %v792_v42 }
 0xa19   :  { %v1145_v45 = vpop.eup %1144 }
 0xa1a   :  { %v793_v50 = vmul.f32 %v1145_v45, %v777_v19  ;;  %v804_v51 = vadd.f32 %v979_v35, %v798_v44  ;;  %v1147_v9 = vpop.eup %1146  ;;  %v864_v19 = vrot.slane %v1405_v49, %v243_v22 }
 0xa1b   :  { %v1149_v13 = vpop.eup %1148 }
 0xa1c   :  { %v799_v52 = vmul.f32 %v797_v40, %v793_v50  ;;  %v827_v54 = vmul.f32 %v820_v48, %v804_v51 }
 0xa1e   :  { %v805_v55 = vadd.f32 %v979_v35, %v799_v52  ;;  %v829_v57 = vsel %vm190_vm5, %v827_v54, 0.0 }
 0xa1f   :  { %v830_v59 = vrot.slane %v829_v57, 4 }
 0xa20   :  { %v828_v61 = vmul.f32 %v825_v58, %v805_v55 }
 0xa21   :  { %v831_v62 = vadd.f32 %v830_v59, %v829_v57 }
 0xa22   :  { %v836_v63 = vsel %vm190_vm5, %v828_v61, 0.0 }
 0xa23   :  { %v837_v0 = vrot.slane %v836_v63, 4  ;;  %v832_v1 = vrot.slane %v831_v62, 2 }
 0xa25   :  { %v838_v3 = vadd.f32 %v837_v0, %v836_v63  ;;  %v833_v4 = vadd.f32 %v832_v1, %v831_v62 }
 0xa27   :  { %v839_v5 = vrot.slane %v838_v3, 2  ;;  %v834_v6 = vrot.slane %v833_v4, 1 }
 0xa29   :  { %v840_v7 = vadd.f32 %v839_v5, %v838_v3  ;;  %v835_v8 = vadd.f32 %v834_v6, %v833_v4 }
 0xa2b   :  { %v841_v43 = vrot.slane %v840_v7, 1  ;;  %v852_v10 = vmul.f32 %v1147_v9, %v835_v8 }
 0xa2d   :  { %v842_v11 = vadd.f32 %v841_v43, %v840_v7  ;;  %v855_v15 = vpack.c.bf16 %v852_v10, %v852_v10 }
 0xa2f   :  { %v854_v14 = vmul.f32 %v1149_v13, %v842_v11  ;;  %v867_v17 = vunpack.c.l.b16 %v855_v15 }
 0xa31   :  { %v856_v16 = vpack.c.bf16 %v854_v14, %v854_v14 }
 0xa33   :  { %v868_v30 = vunpack.c.l.b16 %v856_v16 }
 0xa35   :  { %v870_v18 = vsel %vm869_vm10, %v868_v30, %v867_v17 }
 0xa36   :  { %v871_v31 = vpack.c.b16 %v870_v18, %v870_v18 }
 0xa38   :  { %1100 = vmatmul.mubr.msk.bf16.vlgmr.msra.gmra.mxu0 %vm190_vm5, %v871_v31 }
 0xaf8   :  { %v921_v20 = vpop.f32.mrf.mxu0 }
 0xaf9   :  { %v922_v24 = vadd.f32 %v921_v20, %v864_v19 }
 0xafa   :  { %v1101_v53 = vpop.f32.mrf.mxu0 }
 0xafb   :  { %v927_v56 = vmax.f32 %v922_v24, 0.0 }
 0xafc   :  { %v924_v26 = vpop.f32.mrf.mxu0 }
 0xafd   :  { %v932_v27 = vmul.f32 %v931_v25, %v927_v56 }
 0xafe   :  { %v1102_v28 = vpop.f32.mrf.mxu0 }
 0xaff   :  { %v934_v29 = vsel %vm933_vm11, %v932_v27, 0.0 }
 0xb00   :  { %935 = vadd.xlane.f32.xlu1 %v934_v29 }
 0xb89   :  { %v936_v22 = vpop.xlane.xlu1 %935 }
 0xb8a   :  { %v941_v33 = vadd.f32 %v940_v32, %v936_v22 }
 0xb8c   :  { %943 = vst.msk [vmem:[%s1464_s12] sm:$0x3] %vm942_vm12, %v941_v33 }

</bundles_post_ra>
